<compile_context>
chip_gen: v6e
topology: v6e:2x2x1
jax: 0.10.0
libtpu: 0.0.40
codegen_flags: <defaults>
</compile_context>

<pallas_src>
import jax
import jax.numpy as jnp
from jax import lax
from jax.experimental import pallas as pl
from jax.experimental.pallas import tpu as pltpu

NUM_BLOCKS = 3
K4_CHUNK = 512          # max live width of the 4h intermediate inside a block


def bigger_model_kernel(x_ref, w1_ref, b1_ref,
                        wa_ref, ba_ref, wb_ref, bb_ref,
                        w2_ref, b2_ref, out_ref):
    hidden4 = wa_ref.shape[1]
    chunk = min(hidden4, K4_CHUNK)

    # fc1: contract x's last axis directly -> (hidden, tile_b) transposed
    # activation layout (features on sublanes, batch on lanes).  No wrapper
    # transpose of x and no in-kernel transpose of a big activation.
    x_bf = x_ref[...].astype(jnp.bfloat16)                    # (tile_b, in)
    h = lax.dot_general(w1_ref[...], x_bf,
                        dimension_numbers=(((1,), (1,)), ((), ())),
                        preferred_element_type=jnp.float32)   # (hidden, tile_b)
    h = h + b1_ref[...]                                        # (hidden,1) lane-bcast

    # Blocks (the PyTorch module does NOT add a skip; forward is block(x)).
    for blk in range(NUM_BLOCKS):                              # statically unrolled
        h_bf = h.astype(jnp.bfloat16)
        acc = None
        # Chunk the 4h intermediate so its live footprint stays bounded when
        # hidden grows; single chunk (same math as before) at small hidden.
        for c0 in range(0, hidden4, chunk):
            t = jnp.dot(wa_ref[blk, c0:c0 + chunk, :], h_bf,
                        preferred_element_type=jnp.float32)
            t = jnp.maximum(t + ba_ref[blk, c0:c0 + chunk, :], 0.0)
            part = jnp.dot(wb_ref[blk, :, c0:c0 + chunk],
                           t.astype(jnp.bfloat16),
                           preferred_element_type=jnp.float32)
            acc = part if acc is None else acc + part
        h = acc + bb_ref[blk]

    # fc2 (single output feature): VPU multiply + sublane reduction instead of
    # a degenerate N=1 MXU matmul.  Result is directly a lane-dense row.
    logits = jnp.sum(h * w2_ref[...], axis=0, keepdims=True)   # (1, tile_b)
    logits = logits + b2_ref[...]                               # (1,1) bcast
    # exp and the reciprocal both ride the EUP slot.
    sig = pl.reciprocal(1.0 + jnp.exp(-logits), approx=True)
    out_ref[...] = sig.astype(out_ref.dtype)


def _pick_tile_b(batch):
    # Multiples of 256 fill the 256-wide MXU on v6e/v7x; keep >=2 grid steps
    # when the batch allows it so both v7x TensorCores get work.  On v5e the
    # MXU is 128-wide, so 256 is still aligned and fewer steps is better.
    for t in (512, 256):
        if batch >= 2 * t:
            return t
    return 256 if batch > 128 else 128


def _vmem_estimate_bytes(input_dim, hidden, hidden4, tile_b):
    bf16, f32 = 2, 4
    chunk = min(hidden4, K4_CHUNK)
    weights = ((hidden * input_dim + NUM_BLOCKS * 2 * hidden * hidden4) * bf16
               + (hidden + NUM_BLOCKS * (hidden4 + hidden) + hidden + 1) * f32)
    io = 2 * tile_b * input_dim * f32 + 2 * tile_b * f32        # 2-buffered x / out tiles
    acts = tile_b * (2 * hidden + chunk) * (f32 + bf16)          # h, acc, t (+bf16 copies)
    return weights + io + acts


def bigger_model_forward(x, params, *, tile_b=None):
    (w1, b1, wa, ba, wb, bb, w2, b2) = params
    batch, input_dim = x.shape
    hidden = w1.shape[0]
    hidden4 = wa.shape[1]

    if tile_b is None:
        tile_b = _pick_tile_b(batch)

    # Pad ragged batches with zero rows; they are sliced off after the call.
    padded = pl.cdiv(batch, tile_b) * tile_b
    if padded != batch:
        x = jnp.pad(x, ((0, padded - batch), (0, 0)))
    num_tiles = padded // tile_b

    def resident(shape):
        # Whole array, constant block index, single-buffered: stays VMEM
        # resident across the batch grid without a wasted second buffer.
        return pl.BlockSpec(shape, lambda i, _s=shape: tuple(0 for _ in _s),
                            pipeline_mode=pl.Buffered(1))

    # Only set a scoped-VMEM limit once the resident set approaches v5e's
    # 16 MiB default; capped at 64 MiB (v7x physical per-TC VMEM).
    vmem_bytes = _vmem_estimate_bytes(input_dim, hidden, hidden4, tile_b)
    vmem_limit = int(min(2 * vmem_bytes, 64 << 20)) if vmem_bytes > (12 << 20) else None
    compiler_params = pltpu.CompilerParams(
        dimension_semantics=("parallel",),
        vmem_limit_bytes=vmem_limit,
    )

    out_row = pl.pallas_call(
        bigger_model_kernel,
        out_shape=jax.ShapeDtypeStruct((1, padded), jnp.float32),
        grid_spec=pltpu.PrefetchScalarGridSpec(
            num_scalar_prefetch=0,
            grid=(num_tiles,),
            in_specs=[
                pl.BlockSpec((tile_b, input_dim), lambda i: (i, 0)),  # x row tile
                resident((hidden, input_dim)),                        # w1
                resident((hidden, 1)),                                # b1
                resident((NUM_BLOCKS, hidden4, hidden)),              # wa
                resident((NUM_BLOCKS, hidden4, 1)),                   # ba
                resident((NUM_BLOCKS, hidden, hidden4)),              # wb
                resident((NUM_BLOCKS, hidden, 1)),                    # bb
                resident((hidden, 1)),                                # w2 (=fc2.weight.T)
                resident((1, 1)),                                     # b2
            ],
            out_specs=pl.BlockSpec((1, tile_b), lambda i: (0, i)),    # lane-dense
        ),
        compiler_params=compiler_params,
    )(x, w1, b1, wa, ba, wb, bb, w2, b2)

    out = jnp.reshape(out_row, (padded, 1))
    return out[:batch] if padded != batch else out


def init_params(key, input_dim, hidden):
    hidden4 = hidden * 4
    ks = jax.random.split(key, 8)
    scale = 0.05
    # Big-matmul weights in bf16 (halves DMA/VMEM, full-rate MXU on v6e/v7x);
    # biases, w2 and everything around the sigmoid stay f32.
    w1 = (scale * jax.random.normal(ks[0], (hidden, input_dim))).astype(jnp.bfloat16)
    b1 = scale * jax.random.normal(ks[1], (hidden, 1), jnp.float32)
    wa = (scale * jax.random.normal(ks[2], (NUM_BLOCKS, hidden4, hidden))).astype(jnp.bfloat16)
    ba = scale * jax.random.normal(ks[3], (NUM_BLOCKS, hidden4, 1), jnp.float32)
    wb = (scale * jax.random.normal(ks[4], (NUM_BLOCKS, hidden, hidden4))).astype(jnp.bfloat16)
    bb = scale * jax.random.normal(ks[5], (NUM_BLOCKS, hidden, 1), jnp.float32)
    w2 = scale * jax.random.normal(ks[6], (hidden, 1), jnp.float32)
    b2 = scale * jax.random.normal(ks[7], (1, 1), jnp.float32)
    return (w1, b1, wa, ba, wb, bb, w2, b2)


def reference_forward(x, params):
    """Pure-JAX reference mirroring the kernel's casts (row layout)."""
    (w1, b1, wa, ba, wb, bb, w2, b2) = params
    h = jnp.dot(x.astype(jnp.bfloat16), w1.T,
                preferred_element_type=jnp.float32) + b1.T
    for blk in range(NUM_BLOCKS):
        t = jnp.dot(h.astype(jnp.bfloat16), wa[blk].T,
                    preferred_element_type=jnp.float32) + ba[blk].T
        t = jnp.maximum(t, 0.0)
        h = jnp.dot(t.astype(jnp.bfloat16), wb[blk].T,
                    preferred_element_type=jnp.float32) + bb[blk].T
    logits = jnp.sum(h * w2[:, 0], axis=-1, keepdims=True) + b2
    return 1.0 / (1.0 + jnp.exp(-logits))


if __name__ == "__main__":
    key = jax.random.PRNGKey(0)
    k_x, k_p = jax.random.split(key)

    # Small shapes consistent with the module (hidden*4 = 128 lanes).
    batch, input_dim, hidden = 512, 16, 32
    x = jax.random.normal(k_x, (batch, input_dim), jnp.float32)
    params = init_params(k_p, input_dim, hidden)

    out = bigger_model_forward(x, params)        # tile_b auto -> 256, grid=(2,)
    out = jax.block_until_ready(out)
    ref = reference_forward(x, params)
    assert out.shape == (batch, 1)
    assert jnp.allclose(out, ref, atol=1e-3, rtol=1e-3), \
        float(jnp.max(jnp.abs(out - ref)))

    # Ragged batch: exercises the zero-pad + slice-back path.
    x_r = jax.random.normal(k_x, (300, input_dim), jnp.float32)
    out_r = jax.block_until_ready(bigger_model_forward(x_r, params))
    ref_r = reference_forward(x_r, params)
    assert out_r.shape == (300, 1)
    assert jnp.allclose(out_r, ref_r, atol=1e-3, rtol=1e-3)

    print("KERNEL_OK")
</pallas_src>

<mosaic_0001>
module attributes {stable_mosaic.version = 11 : i64} {
  func.func @bigger_model_kernel(%arg0: i32, %arg1: memref<256x16xf32, #tpu.memory_space<vmem>>, %arg2: memref<32x16xbf16, #tpu.memory_space<vmem>>, %arg3: memref<32x1xf32, #tpu.memory_space<vmem>>, %arg4: memref<3x128x32xbf16, #tpu.memory_space<vmem>>, %arg5: memref<3x128x1xf32, #tpu.memory_space<vmem>>, %arg6: memref<3x32x128xbf16, #tpu.memory_space<vmem>>, %arg7: memref<3x32x1xf32, #tpu.memory_space<vmem>>, %arg8: memref<32x1xf32, #tpu.memory_space<vmem>>, %arg9: memref<1x1xf32, #tpu.memory_space<vmem>>, %arg10: memref<1x256xf32, #tpu.memory_space<vmem>>) attributes {dimension_semantics = [#tpu.dimension_semantics<parallel>], iteration_bounds = array<i64: 2>, scalar_prefetch = 0 : i64, scratch_operands = 0 : i64, tpu.core_type = #tpu.core_type<tc>, window_params = [{transform_indices = @transform_0, window_bounds = array<i64: 256, 16>}, {pipeline_mode = #tpu.pipeline_mode<synchronous>, transform_indices = @transform_1, window_bounds = array<i64: 32, 16>}, {pipeline_mode = #tpu.pipeline_mode<synchronous>, transform_indices = @transform_2, window_bounds = array<i64: 32, 1>}, {pipeline_mode = #tpu.pipeline_mode<synchronous>, transform_indices = @transform_3, window_bounds = array<i64: 3, 128, 32>}, {pipeline_mode = #tpu.pipeline_mode<synchronous>, transform_indices = @transform_4, window_bounds = array<i64: 3, 128, 1>}, {pipeline_mode = #tpu.pipeline_mode<synchronous>, transform_indices = @transform_5, window_bounds = array<i64: 3, 32, 128>}, {pipeline_mode = #tpu.pipeline_mode<synchronous>, transform_indices = @transform_6, window_bounds = array<i64: 3, 32, 1>}, {pipeline_mode = #tpu.pipeline_mode<synchronous>, transform_indices = @transform_7, window_bounds = array<i64: 32, 1>}, {pipeline_mode = #tpu.pipeline_mode<synchronous>, transform_indices = @transform_8, window_bounds = array<i64: 1, 1>}, {transform_indices = @transform_9, window_bounds = array<i64: 1, 256>}]} {
    %c0 = arith.constant 0 : index
    %c0_0 = arith.constant 0 : index
    %0 = vector.load %arg1[%c0, %c0_0] : memref<256x16xf32, #tpu.memory_space<vmem>>, vector<256x16xf32>
    %1 = arith.truncf %0 : vector<256x16xf32> to vector<256x16xbf16>
    %c0_1 = arith.constant 0 : index
    %c0_2 = arith.constant 0 : index
    %2 = vector.load %arg2[%c0_1, %c0_2] : memref<32x16xbf16, #tpu.memory_space<vmem>>, vector<32x16xbf16>
    %cst = arith.constant dense<0.000000e+00> : vector<32x256xf32>
    %3 = tpu.matmul %2, %1, %cst {dimension_numbers = #tpu.dot_dimension_numbers<[1], [1], [0], [0], [0, 0, 1, 0], [], []>} : vector<32x16xbf16>, vector<256x16xbf16>, vector<32x256xf32> -> vector<32x256xf32>
    %c0_3 = arith.constant 0 : index
    %c0_4 = arith.constant 0 : index
    %4 = vector.load %arg3[%c0_3, %c0_4] : memref<32x1xf32, #tpu.memory_space<vmem>>, vector<32x1xf32>
    %5 = vector.broadcast %4 : vector<32x1xf32> to vector<32x256xf32>
    %6 = arith.addf %3, %5 : vector<32x256xf32>
    %7 = arith.truncf %6 : vector<32x256xf32> to vector<32x256xbf16>
    %c0_5 = arith.constant 0 : index
    %c0_6 = arith.constant 0 : index
    %c0_7 = arith.constant 0 : index
    %8 = vector.load %arg4[%c0_5, %c0_6, %c0_7] : memref<3x128x32xbf16, #tpu.memory_space<vmem>>, vector<1x128x32xbf16>
    %9 = vector.shape_cast %8 : vector<1x128x32xbf16> to vector<128x32xbf16>
    %cst_8 = arith.constant dense<0.000000e+00> : vector<128x256xf32>
    %10 = tpu.matmul %9, %7, %cst_8 {dimension_numbers = #tpu.dot_dimension_numbers<[1], [0], [0], [1], [0, 0, 1, 1], [], []>} : vector<128x32xbf16>, vector<32x256xbf16>, vector<128x256xf32> -> vector<128x256xf32>
    %c0_9 = arith.constant 0 : index
    %c0_10 = arith.constant 0 : index
    %c0_11 = arith.constant 0 : index
    %11 = vector.load %arg5[%c0_9, %c0_10, %c0_11] : memref<3x128x1xf32, #tpu.memory_space<vmem>>, vector<1x128x1xf32>
    %12 = vector.shape_cast %11 : vector<1x128x1xf32> to vector<128x1xf32>
    %13 = vector.broadcast %12 : vector<128x1xf32> to vector<128x256xf32>
    %14 = arith.addf %10, %13 : vector<128x256xf32>
    %cst_12 = arith.constant 0.000000e+00 : f32
    %15 = vector.broadcast %cst_12 : f32 to vector<128x256xf32>
    %16 = arith.maximumf %14, %15 : vector<128x256xf32>
    %c0_13 = arith.constant 0 : index
    %c0_14 = arith.constant 0 : index
    %c0_15 = arith.constant 0 : index
    %17 = vector.load %arg6[%c0_13, %c0_14, %c0_15] : memref<3x32x128xbf16, #tpu.memory_space<vmem>>, vector<1x32x128xbf16>
    %18 = vector.shape_cast %17 : vector<1x32x128xbf16> to vector<32x128xbf16>
    %19 = arith.truncf %16 : vector<128x256xf32> to vector<128x256xbf16>
    %cst_16 = arith.constant dense<0.000000e+00> : vector<32x256xf32>
    %20 = tpu.matmul %18, %19, %cst_16 {dimension_numbers = #tpu.dot_dimension_numbers<[1], [0], [0], [1], [0, 0, 1, 1], [], []>} : vector<32x128xbf16>, vector<128x256xbf16>, vector<32x256xf32> -> vector<32x256xf32>
    %c0_17 = arith.constant 0 : index
    %c0_18 = arith.constant 0 : index
    %c0_19 = arith.constant 0 : index
    %21 = vector.load %arg7[%c0_17, %c0_18, %c0_19] : memref<3x32x1xf32, #tpu.memory_space<vmem>>, vector<1x32x1xf32>
    %22 = vector.shape_cast %21 : vector<1x32x1xf32> to vector<32x1xf32>
    %23 = vector.broadcast %22 : vector<32x1xf32> to vector<32x256xf32>
    %24 = arith.addf %20, %23 : vector<32x256xf32>
    %25 = arith.truncf %24 : vector<32x256xf32> to vector<32x256xbf16>
    %c1 = arith.constant 1 : index
    %c0_20 = arith.constant 0 : index
    %c0_21 = arith.constant 0 : index
    %26 = vector.load %arg4[%c1, %c0_20, %c0_21] : memref<3x128x32xbf16, #tpu.memory_space<vmem>>, vector<1x128x32xbf16>
    %27 = vector.shape_cast %26 : vector<1x128x32xbf16> to vector<128x32xbf16>
    %cst_22 = arith.constant dense<0.000000e+00> : vector<128x256xf32>
    %28 = tpu.matmul %27, %25, %cst_22 {dimension_numbers = #tpu.dot_dimension_numbers<[1], [0], [0], [1], [0, 0, 1, 1], [], []>} : vector<128x32xbf16>, vector<32x256xbf16>, vector<128x256xf32> -> vector<128x256xf32>
    %c1_23 = arith.constant 1 : index
    %c0_24 = arith.constant 0 : index
    %c0_25 = arith.constant 0 : index
    %29 = vector.load %arg5[%c1_23, %c0_24, %c0_25] : memref<3x128x1xf32, #tpu.memory_space<vmem>>, vector<1x128x1xf32>
    %30 = vector.shape_cast %29 : vector<1x128x1xf32> to vector<128x1xf32>
    %31 = vector.broadcast %30 : vector<128x1xf32> to vector<128x256xf32>
    %32 = arith.addf %28, %31 : vector<128x256xf32>
    %cst_26 = arith.constant 0.000000e+00 : f32
    %33 = vector.broadcast %cst_26 : f32 to vector<128x256xf32>
    %34 = arith.maximumf %32, %33 : vector<128x256xf32>
    %c1_27 = arith.constant 1 : index
    %c0_28 = arith.constant 0 : index
    %c0_29 = arith.constant 0 : index
    %35 = vector.load %arg6[%c1_27, %c0_28, %c0_29] : memref<3x32x128xbf16, #tpu.memory_space<vmem>>, vector<1x32x128xbf16>
    %36 = vector.shape_cast %35 : vector<1x32x128xbf16> to vector<32x128xbf16>
    %37 = arith.truncf %34 : vector<128x256xf32> to vector<128x256xbf16>
    %cst_30 = arith.constant dense<0.000000e+00> : vector<32x256xf32>
    %38 = tpu.matmul %36, %37, %cst_30 {dimension_numbers = #tpu.dot_dimension_numbers<[1], [0], [0], [1], [0, 0, 1, 1], [], []>} : vector<32x128xbf16>, vector<128x256xbf16>, vector<32x256xf32> -> vector<32x256xf32>
    %c1_31 = arith.constant 1 : index
    %c0_32 = arith.constant 0 : index
    %c0_33 = arith.constant 0 : index
    %39 = vector.load %arg7[%c1_31, %c0_32, %c0_33] : memref<3x32x1xf32, #tpu.memory_space<vmem>>, vector<1x32x1xf32>
    %40 = vector.shape_cast %39 : vector<1x32x1xf32> to vector<32x1xf32>
    %41 = vector.broadcast %40 : vector<32x1xf32> to vector<32x256xf32>
    %42 = arith.addf %38, %41 : vector<32x256xf32>
    %43 = arith.truncf %42 : vector<32x256xf32> to vector<32x256xbf16>
    %c2 = arith.constant 2 : index
    %c0_34 = arith.constant 0 : index
    %c0_35 = arith.constant 0 : index
    %44 = vector.load %arg4[%c2, %c0_34, %c0_35] : memref<3x128x32xbf16, #tpu.memory_space<vmem>>, vector<1x128x32xbf16>
    %45 = vector.shape_cast %44 : vector<1x128x32xbf16> to vector<128x32xbf16>
    %cst_36 = arith.constant dense<0.000000e+00> : vector<128x256xf32>
    %46 = tpu.matmul %45, %43, %cst_36 {dimension_numbers = #tpu.dot_dimension_numbers<[1], [0], [0], [1], [0, 0, 1, 1], [], []>} : vector<128x32xbf16>, vector<32x256xbf16>, vector<128x256xf32> -> vector<128x256xf32>
    %c2_37 = arith.constant 2 : index
    %c0_38 = arith.constant 0 : index
    %c0_39 = arith.constant 0 : index
    %47 = vector.load %arg5[%c2_37, %c0_38, %c0_39] : memref<3x128x1xf32, #tpu.memory_space<vmem>>, vector<1x128x1xf32>
    %48 = vector.shape_cast %47 : vector<1x128x1xf32> to vector<128x1xf32>
    %49 = vector.broadcast %48 : vector<128x1xf32> to vector<128x256xf32>
    %50 = arith.addf %46, %49 : vector<128x256xf32>
    %cst_40 = arith.constant 0.000000e+00 : f32
    %51 = vector.broadcast %cst_40 : f32 to vector<128x256xf32>
    %52 = arith.maximumf %50, %51 : vector<128x256xf32>
    %c2_41 = arith.constant 2 : index
    %c0_42 = arith.constant 0 : index
    %c0_43 = arith.constant 0 : index
    %53 = vector.load %arg6[%c2_41, %c0_42, %c0_43] : memref<3x32x128xbf16, #tpu.memory_space<vmem>>, vector<1x32x128xbf16>
    %54 = vector.shape_cast %53 : vector<1x32x128xbf16> to vector<32x128xbf16>
    %55 = arith.truncf %52 : vector<128x256xf32> to vector<128x256xbf16>
    %cst_44 = arith.constant dense<0.000000e+00> : vector<32x256xf32>
    %56 = tpu.matmul %54, %55, %cst_44 {dimension_numbers = #tpu.dot_dimension_numbers<[1], [0], [0], [1], [0, 0, 1, 1], [], []>} : vector<32x128xbf16>, vector<128x256xbf16>, vector<32x256xf32> -> vector<32x256xf32>
    %c2_45 = arith.constant 2 : index
    %c0_46 = arith.constant 0 : index
    %c0_47 = arith.constant 0 : index
    %57 = vector.load %arg7[%c2_45, %c0_46, %c0_47] : memref<3x32x1xf32, #tpu.memory_space<vmem>>, vector<1x32x1xf32>
    %58 = vector.shape_cast %57 : vector<1x32x1xf32> to vector<32x1xf32>
    %59 = vector.broadcast %58 : vector<32x1xf32> to vector<32x256xf32>
    %60 = arith.addf %56, %59 : vector<32x256xf32>
    %c0_48 = arith.constant 0 : index
    %c0_49 = arith.constant 0 : index
    %61 = vector.load %arg8[%c0_48, %c0_49] : memref<32x1xf32, #tpu.memory_space<vmem>>, vector<32x1xf32>
    %62 = vector.broadcast %61 : vector<32x1xf32> to vector<32x256xf32>
    %63 = arith.mulf %60, %62 : vector<32x256xf32>
    %cst_50 = arith.constant dense<0.000000e+00> : vector<256xf32>
    %64 = vector.multi_reduction <add>, %63, %cst_50 [0] : vector<32x256xf32> to vector<256xf32>
    %65 = vector.shape_cast %64 : vector<256xf32> to vector<1x256xf32>
    %c0_51 = arith.constant 0 : index
    %c0_52 = arith.constant 0 : index
    %66 = vector.load %arg9[%c0_51, %c0_52] : memref<1x1xf32, #tpu.memory_space<vmem>>, vector<1x1xf32>
    %67 = vector.broadcast %66 : vector<1x1xf32> to vector<1x256xf32>
    %68 = arith.addf %65, %67 : vector<1x256xf32>
    %cst_53 = arith.constant 0.000000e+00 : f32
    %69 = vector.broadcast %cst_53 : f32 to vector<1x256xf32>
    %70 = arith.subf %69, %68 : vector<1x256xf32>
    %71 = math.exp %70 : vector<1x256xf32>
    %cst_54 = arith.constant 1.000000e+00 : f32
    %72 = vector.broadcast %cst_54 : f32 to vector<1x256xf32>
    %73 = arith.addf %72, %71 : vector<1x256xf32>
    %74 = tpu.reciprocal %73 {approx = true} : vector<1x256xf32> -> vector<1x256xf32>
    %c0_55 = arith.constant 0 : index
    %c0_56 = arith.constant 0 : index
    %75 = vector.load %arg10[%c0_55, %c0_56] : memref<1x256xf32, #tpu.memory_space<vmem>>, vector<1x256xf32>
    tpu.vector_store %arg10[%c0_55, %c0_56], %74 {strides = array<i32>} : memref<1x256xf32, #tpu.memory_space<vmem>>, vector<1x256xf32>,
    return
  }
  func.func @transform_0(%arg0: i32) -> (i32, i32) {
    %c0_i32 = arith.constant 0 : i32
    %c0_i32_0 = arith.constant 0 : i32
    return %arg0, %c0_i32 : i32, i32
  }
  func.func @transform_1(%arg0: i32) -> (i32, i32) {
    %c0_i32 = arith.constant 0 : i32
    %c0_i32_0 = arith.constant 0 : i32
    %c0_i32_1 = arith.constant 0 : i32
    return %c0_i32, %c0_i32_0 : i32, i32
  }
  func.func @transform_2(%arg0: i32) -> (i32, i32) {
    %c0_i32 = arith.constant 0 : i32
    %c0_i32_0 = arith.constant 0 : i32
    %c0_i32_1 = arith.constant 0 : i32
    return %c0_i32, %c0_i32_0 : i32, i32
  }
  func.func @transform_3(%arg0: i32) -> (i32, i32, i32) {
    %c0_i32 = arith.constant 0 : i32
    %c0_i32_0 = arith.constant 0 : i32
    %c0_i32_1 = arith.constant 0 : i32
    %c0_i32_2 = arith.constant 0 : i32
    return %c0_i32, %c0_i32_0, %c0_i32_1 : i32, i32, i32
  }
  func.func @transform_4(%arg0: i32) -> (i32, i32, i32) {
    %c0_i32 = arith.constant 0 : i32
    %c0_i32_0 = arith.constant 0 : i32
    %c0_i32_1 = arith.constant 0 : i32
    %c0_i32_2 = arith.constant 0 : i32
    return %c0_i32, %c0_i32_0, %c0_i32_1 : i32, i32, i32
  }
  func.func @transform_5(%arg0: i32) -> (i32, i32, i32) {
    %c0_i32 = arith.constant 0 : i32
    %c0_i32_0 = arith.constant 0 : i32
    %c0_i32_1 = arith.constant 0 : i32
    %c0_i32_2 = arith.constant 0 : i32
    return %c0_i32, %c0_i32_0, %c0_i32_1 : i32, i32, i32
  }
  func.func @transform_6(%arg0: i32) -> (i32, i32, i32) {
    %c0_i32 = arith.constant 0 : i32
    %c0_i32_0 = arith.constant 0 : i32
    %c0_i32_1 = arith.constant 0 : i32
    %c0_i32_2 = arith.constant 0 : i32
    return %c0_i32, %c0_i32_0, %c0_i32_1 : i32, i32, i32
  }
  func.func @transform_7(%arg0: i32) -> (i32, i32) {
    %c0_i32 = arith.constant 0 : i32
    %c0_i32_0 = arith.constant 0 : i32
    %c0_i32_1 = arith.constant 0 : i32
    return %c0_i32, %c0_i32_0 : i32, i32
  }
  func.func @transform_8(%arg0: i32) -> (i32, i32) {
    %c0_i32 = arith.constant 0 : i32
    %c0_i32_0 = arith.constant 0 : i32
    %c0_i32_1 = arith.constant 0 : i32
    return %c0_i32, %c0_i32_0 : i32, i32
  }
  func.func @transform_9(%arg0: i32) -> (i32, i32) {
    %c0_i32 = arith.constant 0 : i32
    %c0_i32_0 = arith.constant 0 : i32
    return %c0_i32, %arg0 : i32, i32
  }
}

</mosaic_0001>

<bundles_post_ra>
// kernel: tpu_custom_call.1
= control target key start
LH: loop header
LB: loop body
LE: loop exit
PB: predicated region body
PF: predicated region fallthrough
CT: control target
= control target key end

     0   :  { %s3098_s0 = inlined_call_operand.vmem [shape: f32[512,16], index: 0, kind: input, shape index: {}]   ;;  %s3099_s1 = inlined_call_operand.vmem [shape: bf16[32,16], index: 1, kind: input, shape index: {}]   ;;  %s3100_s2 = inlined_call_operand.vmem [shape: f32[32,1], index: 2, kind: input, shape index: {}]   ;;  %s3101_s3 = inlined_call_operand.vmem [shape: bf16[3,128,32], index: 3, kind: input, shape index: {}]   ;;  %s3102_s4 = inlined_call_operand.vmem [shape: f32[3,128,1], index: 4, kind: input, shape index: {}]   ;;  %s3103_s5 = inlined_call_operand.vmem [shape: bf16[3,32,128], index: 5, kind: input, shape index: {}]   ;;  %s3104_s6 = inlined_call_operand.vmem [shape: f32[3,32,1], index: 6, kind: input, shape index: {}]   ;;  %s3105_s7 = inlined_call_operand.vmem [shape: f32[32,1], index: 7, kind: input, shape index: {}]   ;;  %s3106_s8 = inlined_call_operand.<no memory space> [shape: f32[1,1], index: 8, kind: input, shape index: {}]   ;;  %s3107_s9 = inlined_call_operand.hbm [shape: f32[1,512], index: 9, kind: output, shape index: {}]  }
   0x1   :  { %v14_v0 = vstv %s3106_s8 }
   0x2   :  { %15 = vst [vmem:[#allocation2] sm:$0x1] %v14_v0 }
   0x3   :  { %16 = vsyncpa [#allocation4], 0 }
   0x4   :  { %18 = vsyncpa [#allocation4 + $0x1], 0  ;;  %s2395_s11 = smov 0   ;;  %s2397_s12 = smov 0  }
   0x5   :  { %s2399_s13 = smov 0   ;;  %s2401_s14 = smov 0  }
   0x6 LB: > { %s2010_s8 = sadd.s32 4294967295, %s2337_s14   ;;  %s2011_s15 = sadd.s32 4294967294, %s2337_s14   ;;  %s2337_s14 = sphi %s2401_s14, %s3113_s14   ;;  %s2333_s13 = sphi %s2399_s13, %s3112_s13   ;;  %s2329_s12 = sphi %s2397_s12, %s3111_s12   ;;  %s2325_s11 = sphi %s2395_s11, %s3110_s11  }
   0x7   : > { %s2418_s16 = sadd.s32 1, %s2337_s14   ;;  %s225_s17 = sadd.s32 1, %s2333_s13 }
   0x8   : > { %s222_s18 = ssub.s32 %s2337_s14, %s2418_s16  ;;  %p235_p0 = scmp.ne.s32.totalorder %s2333_s13, %s2329_s12 }
   0x9   : > { %p223_p1 = scmp.eq.s32.totalorder %s222_s18, 0  ;;  %p236_p2 = scmp.eq.s32.totalorder %s2010_s8, 1 }
   0xa   : > { %p241_p3 = scmp.ne.s32.totalorder %s2329_s12, %s2325_s11  ;;  %p242_p4 = scmp.eq.s32.totalorder %s2011_s15, 1 }
   0xb   : > { %s2428_s19 = scalar_select %p223_p1, %s2333_s13, %s225_s17  }
   0xc   : > { %p2430_p5 = por %p236_p2, %p235_p0  ;;  %p2434_p6 = por %p242_p4, %p241_p3 }
   0xd   : > { %p2014_p7 = scmp.ge.s32.totalorder %s2337_s14, 1  ;;  %p293_p8 = scmp.lt.s32.totalorder %s2337_s14, 3 }
   0xf   : > { %p294_p9 = pnand %p2014_p7, %p293_p8 }
  0x10   : > { %s2440_s22 = sshll.u32 (!%p294_p9), %s2010_s8, 5  ;;  %s326_s24 = sand.u32 (!%p294_p9), 1, %s2329_s12  }
  0x11   : > { %297 = sbr.rel (%p294_p9) target bundleno = 1902 (0x76e), region = 56  ;;  %p330_p10 = scmp.lt.s32.totalorder (!%p294_p9), %s2440_s22, 63 }
  0x12   : > { %s2015_s25 = sshll.u32 (!%p294_p9), %s326_s24, 1  ;;  %s1950_s30 = scalar_lea.hbm (!%p294_p9), %s3107_s9, %s2440_s22 }
  0x13   : > { %s328_s26 = scalar_lea.vmem (!%p294_p9), [#allocation3], %s2015_s25  ;;  %s1938_s10 = scalar_lea.sflag (!%p294_p9), [#allocation4], %s326_s24 }
  0x14   : > { %s2341_s15 = smov (!%p294_p9), [#allocation3]  }
  0x15   : > { %s2281_s17 = sshll.u32 (!%p294_p9), %s2341_s15, 4  ;;  %s2282_s17 = int_to_ptr.vmem [resolvable:$false] %s2281_s17 }
  0x16   : > { %v391_v1 = vld [vmem:[%s3100_s2 + $0x10] sm:$0xff]  ;;  %v2339_v2 = vmov 0   ;;  %v389_v3 = vld [vmem:[%s3100_s2] sm:$0xff]  ;;  %s331_s27 = scalar_select %p330_p10, %s2440_s22, 63  ;;  %v392_v4 = vld [vmem:[%s3100_s2 + $0x18] sm:$0xff]  ;;  %vm423_vm0 = vcmask 130048  }
  0x17   : > { %2235 = vset.pattern.permute.xlu0 %v2339_v2  ;;  %2236 = vset.pattern.permute.xlu1 %v2339_v2  ;;  %v390_v5 = vld [vmem:[%s3100_s2 + $0x8] sm:$0xff]  ;;  %v565_v6 = vld [vmem:[%s3102_s4 + $0x70] sm:$0xff]  ;;  %v566_v7 = vld [vmem:[%s3102_s4 + $0x78] sm:$0xff]  ;;  %vm687_vm1 = vcmask 261120  }
  0x18   : > { %405 = vperm.xlu0 %2235, %v391_v1   ;;  %395 = vperm.xlu1 %2236, %v389_v3   ;;  %s2017_s8 = sshll.u32 %s331_s27, 3  ;;  %v563_v20 = vld [vmem:[%s3102_s4 + $0x60] sm:$0xff]  ;;  %v564_v21 = vld [vmem:[%s3102_s4 + $0x68] sm:$0xff]  ;;  %v561_v25 = vld [vmem:[%s3102_s4 + $0x50] sm:$0xff]  ;;  %s1952_s27 = sshll.u32 %s328_s26, 4  ;;  %s1953_s27 = int_to_ptr.vmem [resolvable:$true] %s1952_s27 }
  0x19   : > { %754 = vmatprep.mubr.bf16.mxu1 %v2339_v2  ;;  %s2462_s18 = scalar_lea.vmem %s3098_s0, %s2017_s8  ;;  %v562_v26 = vld [vmem:[%s3102_s4 + $0x58] sm:$0xff]  ;;  %v559_v31 = vld [vmem:[%s3102_s4 + $0x40] sm:$0xff]  ;;  %v560_v32 = vld [vmem:[%s3102_s4 + $0x48] sm:$0xff]  ;;  %s2277_s8 = scalar_lea.vmem %s1953_s27, 32 }
  0x1a   : > { %v367_v8 = vld [vmem:[%s2462_s18 + $0xf0] sm:$0xff]  ;;  %v368_v9 = vld [vmem:[%s2462_s18 + $0xf8] sm:$0xff]  ;;  %v365_v13 = vld [vmem:[%s2462_s18 + $0xe0] sm:$0xff]  ;;  %p2278_p11 = scmp.ne.s32.totalorder %s1953_s27, %s2277_s8  ;;  %p2284_p0 = scmp.lt.s32.totalorder %s1953_s27, %s2282_s17 }
  0x1b   : > { %v351_v10 = vld [vmem:[%s2462_s18 + $0x70] sm:$0xff]  ;;  %v384_v11 = vpack.c.bf16 %v368_v9, %v367_v8  ;;  %v352_v12 = vld [vmem:[%s2462_s18 + $0x78] sm:$0xff]  ;;  %v366_v14 = vld [vmem:[%s2462_s18 + $0xe8] sm:$0xff] }
  0x1c   : > { %410 = vperm.xlu0 %2235, %v392_v4   ;;  %400 = vperm.xlu1 %2236, %v390_v5   ;;  %v376_v15 = vpack.c.bf16 %v352_v12, %v351_v10  ;;  %v383_v16 = vpack.c.bf16 %v366_v14, %v365_v13  ;;  %v349_v17 = vld [vmem:[%s2462_s18 + $0x60] sm:$0xff]  ;;  %v350_v18 = vld [vmem:[%s2462_s18 + $0x68] sm:$0xff]  ;;  %v363_v23 = vld [vmem:[%s2462_s18 + $0xd0] sm:$0xff]  ;;  %p2279_p12 = pnand %p2278_p11, %p2430_p5 }
  0x1d   : > { %2186 = vmatprep.subr.msk.bf16.mxu0 %vm423_vm0, %v384_v11  ;;  %v375_v22 = vpack.c.bf16 %v350_v18, %v349_v17  ;;  %v364_v24 = vld [vmem:[%s2462_s18 + $0xd8] sm:$0xff]  ;;  %v347_v29 = vld [vmem:[%s2462_s18 + $0x50] sm:$0xff]  ;;  %v2507_v33 = vld [vmem:[%s3099_s1] sm:$0xff]  }
  0x1e   : > { %v452_v19 = vsel %vm423_vm0, %v376_v15, 0  ;;  %v382_v28 = vpack.c.bf16 %v364_v24, %v363_v23  ;;  %v348_v30 = vld [vmem:[%s2462_s18 + $0x58] sm:$0xff]  ;;  %v361_v35 = vld [vmem:[%s2462_s18 + $0xc0] sm:$0xff]  ;;  %v362_v36 = vld [vmem:[%s2462_s18 + $0xc8] sm:$0xff]  ;;  %2178 = vmatprep.mubr.msk.bf16.mxu0 %vm423_vm0, %v2507_v33  ;;  %p2280_p13 = pneg %p2279_p12 }
  0x1f   : > { %2163 = vmatpush3.bf16.xpose.msra.mxu0 %v452_v19  ;;  %v449_v27 = vsel %vm423_vm0, %v375_v22, 0  ;;  %v374_v34 = vpack.c.bf16 %v348_v30, %v347_v29  ;;  %v557_v37 = vld [vmem:[%s3102_s4 + $0x30] sm:$0xff]  ;;  %v558_v38 = vld [vmem:[%s3102_s4 + $0x38] sm:$0xff]  ;;  %v381_v40 = vpack.c.bf16 %v362_v36, %v361_v35  ;;  %v345_v41 = vld [vmem:[%s2462_s18 + $0x40] sm:$0xff] }
  0x20   : > { %639 = vperm.xlu0 %2235, %v565_v6   ;;  %644 = vperm.xlu1 %2236, %v566_v7   ;;  %v346_v42 = vld [vmem:[%s2462_s18 + $0x48] sm:$0xff]  ;;  %v343_v43 = vld [vmem:[%s2462_s18 + $0x30] sm:$0xff]  ;;  %v555_v44 = vld [vmem:[%s3102_s4 + $0x20] sm:$0xff] }
  0x21   : > { %2187 = vmatprep.subr.msk.bf16.mxu0 %vm423_vm0, %v383_v16  ;;  %v446_v39 = vsel %vm423_vm0, %v374_v34, 0  ;;  %v556_v45 = vld [vmem:[%s3102_s4 + $0x28] sm:$0xff]  ;;  %v344_v46 = vld [vmem:[%s2462_s18 + $0x38] sm:$0xff]  ;;  %v341_v47 = vld [vmem:[%s2462_s18 + $0x20] sm:$0xff]  ;;  %v373_v49 = vpack.c.bf16 %v346_v42, %v345_v41 }
  0x22   : > { %v342_v48 = vld [vmem:[%s2462_s18 + $0x28] sm:$0xff]  ;;  %v359_v50 = vld [vmem:[%s2462_s18 + $0xb0] sm:$0xff]  ;;  %v360_v51 = vld [vmem:[%s2462_s18 + $0xb8] sm:$0xff]  ;;  %v372_v52 = vpack.c.bf16 %v344_v46, %v343_v43 }
  0x23   : > { %v553_v53 = vld [vmem:[%s3102_s4 + $0x10] sm:$0xff]  ;;  %v371_v54 = vpack.c.bf16 %v342_v48, %v341_v47  ;;  %v554_v55 = vld [vmem:[%s3102_s4 + $0x18] sm:$0xff]  ;;  %v443_v56 = vsel %vm423_vm0, %v373_v49, 0  ;;  %v380_v57 = vpack.c.bf16 %v360_v51, %v359_v50  ;;  %v551_v60 = vld [vmem:[%s3102_s4] sm:$0xff] }
  0x24   : > { %629 = vperm.xlu0 %2235, %v563_v20   ;;  %634 = vperm.xlu1 %2236, %v564_v21   ;;  %v440_v58 = vsel %vm423_vm0, %v372_v52, 0  ;;  %v552_v61 = vld [vmem:[%s3102_s4 + $0x8] sm:$0xff]  ;;  %v357_v62 = vld [vmem:[%s2462_s18 + $0xa0] sm:$0xff]  ;;  %v879_v0 = vld [vmem:[%s3104_s6 + $0x10] sm:$0xff] }
  0x25   : > { %v437_v59 = vsel %vm423_vm0, %v371_v54, 0  ;;  %v358_v63 = vld [vmem:[%s2462_s18 + $0xa8] sm:$0xff]  ;;  %v880_v1 = vld [vmem:[%s3104_s6 + $0x18] sm:$0xff]  ;;  %v877_v4 = vld [vmem:[%s3104_s6] sm:$0xff] }
  0x26   : > { %v379_v3 = vpack.c.bf16 %v358_v63, %v357_v62  ;;  %v878_v5 = vld [vmem:[%s3104_s6 + $0x8] sm:$0xff]  ;;  %v355_v6 = vld [vmem:[%s2462_s18 + $0x90] sm:$0xff]  ;;  %v356_v7 = vld [vmem:[%s2462_s18 + $0x98] sm:$0xff] }
  0x27   : > { %2165 = vmatpush3.bf16.xpose.msra.mxu0 %v449_v27  ;;  %v2070_v8 = vld [vmem:[%s3102_s4 + $0xf0] sm:$0xff]  ;;  %v2071_v9 = vld [vmem:[%s3102_s4 + $0xf8] sm:$0xff]  ;;  %v378_v12 = vpack.c.bf16 %v356_v7, %v355_v6  ;;  %v2068_v13 = vld [vmem:[%s3102_s4 + $0xe0] sm:$0xff] }
  0x28   : > { %619 = vperm.xlu0 %2235, %v561_v25   ;;  %624 = vperm.xlu1 %2236, %v562_v26   ;;  %v339_v10 = vld [vmem:[%s2462_s18 + $0x10] sm:$0xff]  ;;  %v340_v11 = vld [vmem:[%s2462_s18 + $0x18] sm:$0xff]  ;;  %v2069_v14 = vld [vmem:[%s3102_s4 + $0xe8] sm:$0xff] }
  0x29   : > { %2188 = vmatprep.subr.msk.bf16.mxu0 %vm423_vm0, %v382_v28  ;;  %v353_v15 = vld [vmem:[%s2462_s18 + $0x80] sm:$0xff]  ;;  %v354_v16 = vld [vmem:[%s2462_s18 + $0x88] sm:$0xff]  ;;  %v370_v17 = vpack.c.bf16 %v340_v11, %v339_v10  ;;  %v2066_v18 = vld [vmem:[%s3102_s4 + $0xd0] sm:$0xff] }
  0x2a   : > { %v2067_v19 = vld [vmem:[%s3102_s4 + $0xd8] sm:$0xff]  ;;  %v377_v21 = vpack.c.bf16 %v354_v16, %v353_v15  ;;  %v337_v22 = vld [vmem:[%s2462_s18] sm:$0xff]  ;;  %v338_v23 = vld [vmem:[%s2462_s18 + $0x8] sm:$0xff]  ;;  %s2283_s18 = scalar_lea.vmem %s2282_s17, 64 }
  0x2b   : > { %v434_v20 = vsel %vm423_vm0, %v370_v17, 0  ;;  %v2064_v24 = vld [vmem:[%s3102_s4 + $0xc0] sm:$0xff]  ;;  %v2065_v25 = vld [vmem:[%s3102_s4 + $0xc8] sm:$0xff]  ;;  %v369_v26 = vpack.c.bf16 %v338_v23, %v337_v22  ;;  %v2062_v27 = vld [vmem:[%s3102_s4 + $0xb0] sm:$0xff]  ;;  %p2285_p1 = scmp.lt.s32.totalorder %s2283_s18, %s2277_s8 }
  0x2c   : > { %609 = vperm.xlu0 %2235, %v559_v31   ;;  %614 = vperm.xlu1 %2236, %v560_v32   ;;  %v2063_v28 = vld [vmem:[%s3102_s4 + $0xb8] sm:$0xff]  ;;  %v2060_v30 = vld [vmem:[%s3102_s4 + $0xa0] sm:$0xff]  ;;  %v2061_v31 = vld [vmem:[%s3102_s4 + $0xa8] sm:$0xff] }
  0x2d   : > { %v431_v29 = vsel %vm423_vm0, %v369_v26, 0  ;;  %v2058_v32 = vld [vmem:[%s3102_s4 + $0x90] sm:$0xff]  ;;  %v2238_v34 = vld [vmem:[%s3099_s1 + $0x8] sm:$0xff]   ;;  %v2059_v35 = vld [vmem:[%s3102_s4 + $0x98] sm:$0xff]  ;;  %p2286_p2 = por %p2285_p1, %p2284_p0 }
  0x2e   : > { %v2056_v36 = vld [vmem:[%s3102_s4 + $0x80] sm:$0xff]  ;;  %v2128_v41 = vld [vmem:[%s3102_s4 + $0x170] sm:$0xff]  ;;  %v2129_v42 = vld [vmem:[%s3102_s4 + $0x178] sm:$0xff] }
  0x2f   : > { %2167 = vmatpush3.bf16.xpose.msra.mxu0 %v446_v39  ;;  %v2092_v39 = vld [vmem:[%s3104_s6 + $0x20] sm:$0xff]  ;;  %v2125_v46 = vld [vmem:[%s3102_s4 + $0x158] sm:$0xff]  ;;  %v2123_v48 = vld [vmem:[%s3102_s4 + $0x148] sm:$0xff]  ;;  %p2287_p3 = pnand %p2286_p2, %p2280_p13 }
  0x30   : > { %599 = vperm.xlu0 %2235, %v557_v37   ;;  %604 = vperm.xlu1 %2236, %v558_v38   ;;  %v2057_v37 = vld [vmem:[%s3102_s4 + $0x88] sm:$0xff]  ;;  %v2094_v38 = vld [vmem:[%s3104_s6 + $0x30] sm:$0xff]  ;;  %v2126_v43 = vld [vmem:[%s3102_s4 + $0x160] sm:$0xff] }
  0x31   : > { %2189 = vmatprep.subr.msk.bf16.mxu0 %vm423_vm0, %v381_v40  ;;  %v2093_v40 = vld [vmem:[%s3104_s6 + $0x28] sm:$0xff]  ;;  %v2122_v47 = vld [vmem:[%s3102_s4 + $0x140] sm:$0xff]  ;;  %v2120_v49 = vld [vmem:[%s3102_s4 + $0x130] sm:$0xff] }
  0x32   : > { %v2121_v50 = vld [vmem:[%s3102_s4 + $0x138] sm:$0xff]  ;;  %v2118_v51 = vld [vmem:[%s3102_s4 + $0x120] sm:$0xff]  ;;  %v2119_v52 = vld [vmem:[%s3102_s4 + $0x128] sm:$0xff] }
  0x33   : > { %v2117_v54 = vld [vmem:[%s3102_s4 + $0x118] sm:$0xff]  ;;  %v1844_v63 = vld [vmem:[%s3105_s7 + $0x10] sm:$0xff] }
  0x34   : > { %589 = vperm.xlu0 %2235, %v555_v44   ;;  %594 = vperm.xlu1 %2236, %v556_v45   ;;  %v2127_v44 = vld [vmem:[%s3102_s4 + $0x168] sm:$0xff]  ;;  %v2124_v45 = vld [vmem:[%s3102_s4 + $0x150] sm:$0xff]  ;;  %v2153_v62 = vld [vmem:[%s3104_s6 + $0x58] sm:$0xff] }
  0x37   : > { %2169 = vmatpush3.bf16.xpose.msra.mxu0 %v443_v56  ;;  %v2115_v56 = vld [vmem:[%s3102_s4 + $0x108] sm:$0xff] }
  0x38   : > { %579 = vperm.xlu0 %2235, %v553_v53   ;;  %584 = vperm.xlu1 %2236, %v554_v55   ;;  %v2116_v53 = vld [vmem:[%s3102_s4 + $0x110] sm:$0xff]  ;;  %v2114_v55 = vld [vmem:[%s3102_s4 + $0x100] sm:$0xff] }
  0x39   : > { %2190 = vmatprep.subr.msk.bf16.mxu0 %vm423_vm0, %v380_v57  ;;  %v2150_v57 = vld [vmem:[%s3104_s6 + $0x40] sm:$0xff] }
  0x3c   : > { %569 = vperm.xlu0 %2235, %v551_v60   ;;  %574 = vperm.xlu1 %2236, %v552_v61   ;;  %v1842_v60 = vld [vmem:[%s3105_s7] sm:$0xff]  ;;  %v1843_v61 = vld [vmem:[%s3105_s7 + $0x8] sm:$0xff] }
  0x3f   : > { %2171 = vmatpush3.bf16.xpose.msra.mxu0 %v440_v58  ;;  %v2151_v58 = vld [vmem:[%s3104_s6 + $0x48] sm:$0xff] }
  0x40   : > { %893 = vperm.xlu0 %2235, %v879_v0   ;;  %898 = vperm.xlu1 %2236, %v880_v1   ;;  %v1845_v0 = vld [vmem:[%s3105_s7 + $0x18] sm:$0xff]  ;;  %v1892_v1 = vld [vmem:[#allocation2] sm:$0x1] }
  0x41   : > { %2191 = vmatprep.subr.msk.bf16.mxu0 %vm423_vm0, %v379_v3 }
  0x44   : > { %883 = vperm.xlu0 %2235, %v877_v4   ;;  %888 = vperm.xlu1 %2236, %v878_v5  }
  0x47   : > { %2173 = vmatpush3.bf16.xpose.msra.mxu0 %v437_v59  ;;  %v2152_v59 = vld [vmem:[%s3104_s6 + $0x50] sm:$0xff] }
  0x48   : > { %1076 = vperm.xlu0 %2235, %v2070_v8   ;;  %1081 = vperm.xlu1 %2236, %v2071_v9  }
  0x49   : > { %2192 = vmatprep.subr.msk.bf16.mxu0 %vm423_vm0, %v378_v12 }
  0x4c   : > { %1066 = vperm.xlu0 %2235, %v2068_v13   ;;  %1071 = vperm.xlu1 %2236, %v2069_v14  }
  0x4f   : > { %2175 = vmatpush3.bf16.xpose.msra.mxu0 %v434_v20 }
  0x50   : > { %1056 = vperm.xlu0 %2235, %v2066_v18   ;;  %1061 = vperm.xlu1 %2236, %v2067_v19  }
  0x51   : > { %2193 = vmatprep.subr.msk.bf16.mxu0 %vm423_vm0, %v377_v21 }
  0x54   : > { %1046 = vperm.xlu0 %2235, %v2064_v24   ;;  %1051 = vperm.xlu1 %2236, %v2065_v25  }
  0x57   : > { %2177 = vmatpush3.bf16.xpose.msra.mxu0 %v431_v29  ;;  %v2241_v29 = vld [vmem:[%s3101_s3 + $0x10] sm:$0xff]  }
  0x58   : > { %1036 = vperm.xlu0 %2235, %v2062_v27   ;;  %1041 = vperm.xlu1 %2236, %v2063_v28   ;;  %v2239_v27 = vld [vmem:[%s3101_s3] sm:$0xff]   ;;  %v2240_v28 = vld [vmem:[%s3101_s3 + $0x8] sm:$0xff]  }
  0x5c   : > { %1026 = vperm.xlu0 %2235, %v2060_v30   ;;  %1031 = vperm.xlu1 %2236, %v2061_v31   ;;  %v2242_v30 = vld [vmem:[%s3101_s3 + $0x18] sm:$0xff]   ;;  %v2243_v31 = vld [vmem:[%s3101_s3 + $0x20] sm:$0xff]  }
  0x5e   : > { %2179 = vmatmul.mubr.msk.bf16.vlgmr.msra.gmra.mxu0 %vm423_vm0, %v2507_v33  ;;  %v2095_v33 = vld [vmem:[%s3104_s6 + $0x38] sm:$0xff] }
  0x5f   : > { %2180 = vmatprep.mubr.msk.bf16.mxu0 %vm423_vm0, %v2238_v34 }
  0x60   : > { %1016 = vperm.xlu0 %2235, %v2058_v32   ;;  %1021 = vperm.xlu1 %2236, %v2059_v35   ;;  %v2244_v32 = vld [vmem:[%s3101_s3 + $0x28] sm:$0xff]   ;;  %v2246_v35 = vld [vmem:[%s3101_s3 + $0x38] sm:$0xff]  }
  0x64   : > { %1006 = vperm.xlu0 %2235, %v2056_v36   ;;  %1011 = vperm.xlu1 %2236, %v2057_v37  }
  0x66   : > { %2181 = vmatmul.mubr.msk.bf16.gmra.mxu0 %vm423_vm0, %v2238_v34  ;;  %v2245_v34 = vld [vmem:[%s3101_s3 + $0x30] sm:$0xff]  }
  0x67   : > { %744 = vmatprep.mubr.bf16.mxu0 %v2339_v2 }
  0x68   : > { %1331 = vperm.xlu0 %2235, %v2094_v38   ;;  %1336 = vperm.xlu1 %2236, %v2095_v33  }
  0x6c   : > { %1321 = vperm.xlu0 %2235, %v2092_v39   ;;  %1326 = vperm.xlu1 %2236, %v2093_v40  }
  0x70   : > { %1514 = vperm.xlu0 %2235, %v2128_v41   ;;  %1519 = vperm.xlu1 %2236, %v2129_v42  }
  0x74   : > { %1504 = vperm.xlu0 %2235, %v2126_v43   ;;  %1509 = vperm.xlu1 %2236, %v2127_v44  }
  0x78   : > { %1494 = vperm.xlu0 %2235, %v2124_v45   ;;  %1499 = vperm.xlu1 %2236, %v2125_v46  }
  0x7c   : > { %1484 = vperm.xlu0 %2235, %v2122_v47   ;;  %1489 = vperm.xlu1 %2236, %v2123_v48  }
  0x80   : > { %1474 = vperm.xlu0 %2235, %v2120_v49   ;;  %1479 = vperm.xlu1 %2236, %v2121_v50  }
  0x84   : > { %1464 = vperm.xlu0 %2235, %v2118_v51   ;;  %1469 = vperm.xlu1 %2236, %v2119_v52  }
  0x88   : > { %1454 = vperm.xlu0 %2235, %v2116_v53   ;;  %1459 = vperm.xlu1 %2236, %v2117_v54  }
  0x8c   : > { %1444 = vperm.xlu0 %2235, %v2114_v55   ;;  %1449 = vperm.xlu1 %2236, %v2115_v56  }
  0x90   : > { %1759 = vperm.xlu0 %2235, %v2150_v57   ;;  %1764 = vperm.xlu1 %2236, %v2151_v58  }
  0x93   : > { %v406_v7 = vpop.permute.xlu0 %405  ;;  %v396_v8 = vpop.permute.xlu1 %395 }
  0x94   : > { %1769 = vperm.xlu0 %2235, %v2152_v59   ;;  %1848 = vperm.xlu1 %2236, %v1842_v60  }
  0x97   : > { %v411_v12 = vpop.permute.xlu0 %410  ;;  %v401_v13 = vpop.permute.xlu1 %400 }
  0x98   : > { %1853 = vperm.xlu0 %2235, %v1843_v61   ;;  %1774 = vperm.xlu1 %2236, %v2153_v62  }
  0x9b   : > { %v640_v36 = vpop.permute.xlu0 %639  ;;  %v645_v37 = vpop.permute.xlu1 %644 }
  0x9c   : > { %1858 = vperm.xlu0 %2235, %v1844_v63   ;;  %1863 = vperm.xlu1 %2236, %v1845_v0  }
  0x9f   : > { %v630_v38 = vpop.permute.xlu0 %629  ;;  %v635_v33 = vpop.permute.xlu1 %634 }
  0xa0   : > { %1895 = vperm.xlu0 %2235, %v1892_v1  }
  0xa3   : > { %v2759_v39 = vpop.permute.xlu0 %619  ;;  %v2761_v40 = vpop.permute.xlu1 %624 }
  0xa7   : > { %v2763_v41 = vpop.permute.xlu0 %609  ;;  %v2765_v42 = vpop.permute.xlu1 %614 }
  0xab   : > { %v2767_v43 = vpop.permute.xlu0 %599  ;;  %v2769_v44 = vpop.permute.xlu1 %604 }
  0xaf   : > { %v2771_v45 = vpop.permute.xlu0 %589  ;;  %v2773_v46 = vpop.permute.xlu1 %594 }
  0xb3   : > { %v580_v48 = vpop.permute.xlu0 %579  ;;  %v585_v51 = vpop.permute.xlu1 %584 }
 0x11e   : > { %v512_v3 = vpop.f32.mrf.mxu0 }
 0x11f   : > { %v513_v25 = vadd.f32 %v512_v3, %v396_v8 }
 0x120   : > { %v514_v4 = vpop.f32.mrf.mxu0 }
 0x121   : > { %v515_v20 = vadd.f32 %v514_v4, %v396_v8 }
 0x122   : > { %v516_v5 = vpop.f32.mrf.mxu0 }
 0x123   : > { %v517_v22 = vadd.f32 %v516_v5, %v401_v13 }
 0x124   : > { %v518_v6 = vpop.f32.mrf.mxu0 }
 0x125   : > { %v519_v16 = vadd.f32 %v518_v6, %v401_v13  ;;  %v531_v26 = vpack.c.bf16 %v517_v22, %v513_v25 }
 0x126   : > { %v522_v9 = vpop.f32.mrf.mxu0 }
 0x127   : > { %v523_v19 = vadd.f32 %v522_v9, %v406_v7  ;;  %v532_v24 = vpack.c.bf16 %v519_v16, %v515_v20 }
 0x128   : > { %v524_v10 = vpop.f32.mrf.mxu0 }
 0x129   : > { %v525_v17 = vadd.f32 %v524_v10, %v406_v7 }
 0x12a   : > { %v526_v11 = vpop.f32.mrf.mxu0 }
 0x12b   : > { %v527_v14 = vadd.f32 %v526_v11, %v411_v12 }
 0x12c   : > { %v528_v15 = vpop.f32.mrf.mxu0 }
 0x12d   : > { %v529_v18 = vadd.f32 %v528_v15, %v411_v12  ;;  %v533_v23 = vpack.c.bf16 %v527_v14, %v523_v19 }
 0x12f   : > { %v534_v21 = vpack.c.bf16 %v529_v18, %v525_v17 }
 0x131   : > { %724 = vmatprep.subr.bf16.mxu0 %v534_v21  ;;  %2182 = vmatprep.subr.bf16.mxu1 %v534_v21 }
 0x132   : > { %725 = vmatpush1.bf16.msra.mxu0 %v533_v23  ;;  %2184 = vmatpush1.bf16.msra.mxu1 %v533_v23 }
 0x133   : > { %726 = vmatprep.subr.bf16.mxu0 %v532_v24  ;;  %2183 = vmatprep.subr.bf16.mxu1 %v532_v24 }
 0x136   : > { %727 = vmatpush1.bf16.msra.mxu0 %v531_v26  ;;  %2185 = vmatpush1.bf16.msra.mxu1 %v531_v26 }
 0x139   : > { %2030 = vmatmul.mubr.msk.bf16.vlgmr.msra.gmra.mxu0 %vm687_vm1, %v2239_v27  ;;  %2031 = vmatmul.mubr.msk.bf16.vlgmr.msra.gmra.mxu1 %vm687_vm1, %v2240_v28 }
 0x13a   : > { %764 = vmatprep.mubr.bf16.mxu1 %v2339_v2  ;;  %1180 = vmatprep.mubr.bf16.mxu0 %v2339_v2 }
 0x141   : > { %2032 = vmatmul.mubr.msk.bf16.gmra.mxu1 %vm687_vm1, %v2241_v29 }
 0x142   : > { %774 = vmatprep.mubr.bf16.mxu1 %v2339_v2 }
 0x149   : > { %2033 = vmatmul.mubr.msk.bf16.gmra.mxu1 %vm687_vm1, %v2242_v30 }
 0x14a   : > { %784 = vmatprep.mubr.bf16.mxu1 %v2339_v2 }
 0x151   : > { %2034 = vmatmul.mubr.msk.bf16.gmra.mxu1 %vm687_vm1, %v2243_v31 }
 0x152   : > { %794 = vmatprep.mubr.bf16.mxu1 %v2339_v2 }
 0x159   : > { %2035 = vmatmul.mubr.msk.bf16.gmra.mxu1 %vm687_vm1, %v2244_v32 }
 0x15a   : > { %804 = vmatprep.mubr.bf16.mxu1 %v2339_v2 }
 0x161   : > { %2036 = vmatmul.mubr.msk.bf16.gmra.mxu1 %vm687_vm1, %v2245_v34 }
 0x162   : > { %814 = vmatprep.mubr.bf16.mxu1 %v2339_v2 }
 0x169   : > { %2037 = vmatmul.mubr.msk.bf16.gmra.mxu1 %vm687_vm1, %v2246_v35 }
 0x16a   : > { %945 = vmatprep.mubr.bf16.mxu1 %v2339_v2 }
 0x1f9   : > { %v756_v47 = vpop.f32.mrf.mxu1 }
 0x1fa   : > { %v757_v50 = vadd.f32 %v756_v47, %v580_v48 }
 0x1fb   : > { %v758_v49 = vpop.f32.mrf.mxu1 }
 0x1fc   : > { %v759_v53 = vadd.f32 %v758_v49, %v580_v48  ;;  %v829_v56 = vmax.f32 %v757_v50, 0.0 }
 0x1fd   : > { %v760_v52 = vpop.f32.mrf.mxu1 }
 0x1fe   : > { %v761_v54 = vadd.f32 %v760_v52, %v585_v51  ;;  %v830_v60 = vmax.f32 %v759_v53, 0.0 }
 0x1ff   : > { %v762_v55 = vpop.f32.mrf.mxu1 }
 0x200   : > { %v831_v57 = vmax.f32 %v761_v54, 0.0  ;;  %v763_v58 = vadd.f32 %v762_v55, %v585_v51 }
 0x201   : > { %v2775_v59 = vpop.f32.mrf.mxu1 }
 0x202   : > { %v2777_v61 = vpack.c.bf16 %v831_v57, %v829_v56  ;;  %v832_v62 = vmax.f32 %v763_v58, 0.0  ;;  %v746_v56 = vpop.f32.mrf.mxu0 }
 0x203   : > { %v2779_v63 = vpop.f32.mrf.mxu1 }
 0x204   : > { %v2781_v0 = vpack.c.bf16 %v832_v62, %v830_v60 }
 0x205   : > { %v2783_v1 = vpop.f32.mrf.mxu1 }
 0x207   : > { %v2785_v3 = vpop.f32.mrf.mxu1 }
 0x209   : > { %v2787_v4 = vpop.f32.mrf.mxu1 }
 0x20b   : > { %v778_v5 = vpop.f32.mrf.mxu1 }
 0x20d   : > { %v780_v6 = vpop.f32.mrf.mxu1 }
 0x20f   : > { %v782_v7 = vpop.f32.mrf.mxu1 }
 0x211   : > { %v786_v8 = vpop.f32.mrf.mxu1 }
 0x213   : > { %v788_v9 = vpop.f32.mrf.mxu1 }
 0x215   : > { %v790_v10 = vpop.f32.mrf.mxu1 }
 0x216   : > { %v791_v62 = vadd.f32 %v790_v10, %v2765_v42 }
 0x217   : > { %v792_v11 = vpop.f32.mrf.mxu1 }
 0x218   : > { %v793_v55 = vadd.f32 %v792_v11, %v2765_v42  ;;  %v773_v42 = vadd.f32 %v2785_v3, %v2773_v46 }
 0x219   : > { %v796_v12 = vpop.f32.mrf.mxu1 }
 0x21a   : > { %v797_v57 = vadd.f32 %v796_v12, %v2759_v39 }
 0x21b   : > { %v798_v13 = vpop.f32.mrf.mxu1 }
 0x21c   : > { %v799_v50 = vadd.f32 %v798_v13, %v2759_v39  ;;  %v779_v39 = vadd.f32 %v778_v5, %v2767_v43  ;;  %v769_v5 = vadd.f32 %v2779_v63, %v2771_v45 }
 0x21d   : > { %v800_v14 = vpop.f32.mrf.mxu1 }
 0x21e   : > { %v801_v53 = vadd.f32 %v800_v14, %v2761_v40  ;;  %v846_v60 = vmax.f32 %v799_v50, 0.0  ;;  %v783_v14 = vadd.f32 %v782_v7, %v2769_v44 }
 0x21f   : > { %v802_v15 = vpop.f32.mrf.mxu1 }
 0x220   : > { %v803_v32 = vadd.f32 %v802_v15, %v2761_v40  ;;  %v847_v13 = vmax.f32 %v801_v53, 0.0  ;;  %v844_v15 = vmax.f32 %v793_v55, 0.0  ;;  %v840_v10 = vmax.f32 %v783_v14, 0.0 }
 0x221   : > { %v806_v16 = vpop.f32.mrf.mxu1 }
 0x222   : > { %v807_v48 = vadd.f32 %v806_v16, %v630_v38  ;;  %v748_v16 = vpop.f32.mrf.mxu0 }
 0x223   : > { %v808_v17 = vpop.f32.mrf.mxu1 }
 0x224   : > { %v809_v28 = vadd.f32 %v808_v17, %v630_v38  ;;  %v849_v58 = vmax.f32 %v807_v48, 0.0  ;;  %v789_v38 = vadd.f32 %v788_v9, %v2763_v41  ;;  %v787_v17 = vadd.f32 %v786_v8, %v2763_v41 }
 0x225   : > { %v810_v18 = vpop.f32.mrf.mxu1  ;;  %v781_v9 = vadd.f32 %v780_v6, %v2769_v44  ;;  %v838_v8 = vmax.f32 %v779_v39, 0.0  ;;  %v771_v44 = vadd.f32 %v2783_v1, %v2773_v46 }
 0x226   : > { %v811_v30 = vadd.f32 %v810_v18, %v635_v33  ;;  %v850_v51 = vmax.f32 %v809_v28, 0.0  ;;  %v845_v18 = vmax.f32 %v797_v57, 0.0  ;;  %v842_v12 = vmax.f32 %v789_v38, 0.0 }
 0x227   : > { %v812_v19 = vpop.f32.mrf.mxu1  ;;  %v841_v41 = vmax.f32 %v787_v17, 0.0  ;;  %v839_v6 = vmax.f32 %v781_v9, 0.0  ;;  %v868_v3 = vpack.c.bf16 %v840_v10, %v838_v8  ;;  %v835_v28 = vmax.f32 %v771_v44, 0.0  ;;  %v2249_v9 = vld [vmem:[%s3101_s3 + $0x40] sm:$0xff]  }
 0x228   : > { %v813_v23 = vadd.f32 %v812_v19, %v635_v33  ;;  %v851_v54 = vmax.f32 %v811_v30, 0.0  ;;  %v843_v19 = vmax.f32 %v791_v62, 0.0  ;;  %v870_v7 = vpack.c.bf16 %v844_v15, %v842_v12  ;;  %v2253_v10 = vld [vmem:[%s3101_s3 + $0x60] sm:$0xff]  }
 0x229   : > { %v816_v20 = vpop.f32.mrf.mxu1 }
 0x22a   : > { %v817_v26 = vadd.f32 %v816_v20, %v640_v36  ;;  %v852_v34 = vmax.f32 %v813_v23, 0.0  ;;  %v873_v40 = vpack.c.bf16 %v851_v54, %v849_v58  ;;  %v871_v20 = vpack.c.bf16 %v847_v13, %v845_v18 }
 0x22b   : > { %v818_v21 = vpop.f32.mrf.mxu1  ;;  %v869_v23 = vpack.c.bf16 %v843_v19, %v841_v41  ;;  %v2250_v19 = vld [vmem:[%s3101_s3 + $0x48] sm:$0xff]  }
 0x22c   : > { %v819_v24 = vadd.f32 %v818_v21, %v640_v36  ;;  %v853_v49 = vmax.f32 %v817_v26, 0.0  ;;  %v874_v33 = vpack.c.bf16 %v852_v34, %v850_v51  ;;  %v750_v21 = vpop.f32.mrf.mxu0  ;;  %v767_v26 = vadd.f32 %v2775_v59, %v2771_v45  ;;  %v2247_v51 = vld [vmem:[%s3103_s5] sm:$0xff]  }
 0x22d   : > { %v820_v22 = vpop.f32.mrf.mxu1 }
 0x22e   : > { %v821_v25 = vadd.f32 %v820_v22, %v645_v37  ;;  %v854_v35 = vmax.f32 %v819_v24, 0.0  ;;  %v777_v22 = vadd.f32 %v2787_v4, %v2767_v43  ;;  %v836_v24 = vmax.f32 %v773_v42, 0.0  ;;  %v575_v4 = vpop.permute.xlu1 %574  ;;  %v2252_v42 = vld [vmem:[%s3101_s3 + $0x58] sm:$0xff]  }
 0x22f   : > { %v822_v27 = vpop.f32.mrf.mxu1  ;;  %v834_v43 = vmax.f32 %v769_v5, 0.0  ;;  %v751_v1 = vadd.f32 %v750_v21, %v575_v4  ;;  %v2255_v21 = vld [vmem:[%s3101_s3 + $0x70] sm:$0xff]  }
 0x230   : > { %v823_v29 = vadd.f32 %v822_v27, %v645_v37  ;;  %v855_v31 = vmax.f32 %v821_v25, 0.0  ;;  %v848_v37 = vmax.f32 %v803_v32, 0.0  ;;  %v752_v25 = vpop.f32.mrf.mxu0  ;;  %v837_v27 = vmax.f32 %v777_v22, 0.0  ;;  %v2256_v22 = vld [vmem:[%s3101_s3 + $0x78] sm:$0xff]  }
 0x231   : > { %v866_v30 = vpack.c.bf16 %v836_v24, %v834_v43  ;;  %v833_v32 = vmax.f32 %v767_v26, 0.0  ;;  %v827_v59 = vmax.f32 %v751_v1, 0.0 }
 0x232   : > { %v856_v47 = vmax.f32 %v823_v29, 0.0  ;;  %v875_v36 = vpack.c.bf16 %v855_v31, %v853_v49  ;;  %v872_v11 = vpack.c.bf16 %v848_v37, %v846_v60  ;;  %v867_v63 = vpack.c.bf16 %v839_v6, %v837_v27  ;;  %v570_v31 = vpop.permute.xlu0 %569 }
 0x233   : > { %v753_v29 = vadd.f32 %v752_v25, %v575_v4  ;;  %v749_v46 = vadd.f32 %v748_v16, %v570_v31  ;;  %v865_v34 = vpack.c.bf16 %v835_v28, %v833_v32 }
 0x234   : > { %v876_v52 = vpack.c.bf16 %v856_v47, %v854_v35  ;;  %v747_v47 = vadd.f32 %v746_v56, %v570_v31 }
 0x235   : > { %v828_v35 = vmax.f32 %v753_v29, 0.0  ;;  %v826_v45 = vmax.f32 %v749_v46, 0.0 }
 0x236   : > { %913 = vmatprep.subr.bf16.mxu1 %v876_v52  ;;  %v825_v49 = vmax.f32 %v747_v47, 0.0  ;;  %v2248_v52 = vld [vmem:[%s3103_s5 + $0x8] sm:$0xff]   ;;  %v894_v37 = vpop.permute.xlu0 %893 }
 0x237   : > { %914 = vmatpush1.bf16.msra.mxu1 %v875_v36  ;;  %v862_v48 = vpack.c.bf16 %v828_v35, %v826_v45  ;;  %v899_v36 = vpop.permute.xlu1 %898 }
 0x238   : > { %915 = vmatprep.subr.bf16.mxu1 %v874_v33  ;;  %v861_v50 = vpack.c.bf16 %v827_v59, %v825_v49 }
 0x23b   : > { %916 = vmatpush1.bf16.msra.mxu1 %v873_v40  ;;  %v889_v57 = vpop.permute.xlu1 %888  ;;  %v884_v40 = vpop.permute.xlu0 %883 }
 0x23c   : > { %917 = vmatprep.subr.bf16.mxu1 %v872_v11 }
 0x23f   : > { %918 = vmatpush1.bf16.msra.mxu1 %v871_v20  ;;  %v2251_v20 = vld [vmem:[%s3101_s3 + $0x50] sm:$0xff]   ;;  %v2860_v41 = vpop.permute.xlu0 %1076  ;;  %v2862_v5 = vpop.permute.xlu1 %1081 }
 0x240   : > { %919 = vmatprep.subr.bf16.mxu1 %v870_v7  ;;  %v2254_v7 = vld [vmem:[%s3101_s3 + $0x68] sm:$0xff]  }
 0x243   : > { %920 = vmatpush1.bf16.msra.mxu1 %v869_v23  ;;  %v2864_v8 = vpop.permute.xlu0 %1066  ;;  %v2866_v44 = vpop.permute.xlu1 %1071 }
 0x244   : > { %921 = vmatprep.subr.bf16.mxu1 %v868_v3 }
 0x247   : > { %922 = vmatpush1.bf16.msra.mxu1 %v867_v63  ;;  %v2868_v6 = vpop.permute.xlu0 %1056  ;;  %v2870_v23 = vpop.permute.xlu1 %1061 }
 0x248   : > { %923 = vmatprep.subr.bf16.mxu1 %v866_v30 }
 0x24b   : > { %924 = vmatpush1.bf16.msra.mxu1 %v865_v34  ;;  %v2872_v24 = vpop.permute.xlu0 %1046  ;;  %v2874_v3 = vpop.permute.xlu1 %1051 }
 0x24c   : > { %925 = vmatprep.subr.bf16.mxu1 %v2781_v0 }
 0x24f   : > { %926 = vmatpush1.bf16.msra.mxu1 %v2777_v61  ;;  %v2876_v25 = vpop.permute.xlu0 %1036  ;;  %v2878_v26 = vpop.permute.xlu1 %1041 }
 0x250   : > { %927 = vmatprep.subr.bf16.mxu1 %v862_v48 }
 0x253   : > { %928 = vmatpush1.bf16.msra.mxu1 %v861_v50  ;;  %v2880_v27 = vpop.permute.xlu0 %1026  ;;  %v2882_v43 = vpop.permute.xlu1 %1031 }
 0x256   : > { %946 = vmatmul.mubr.bf16.vlgmr.msra.gmra.mxu1 %v2247_v51 }
 0x257   : > { %955 = vmatprep.mubr.bf16.mxu1 %v2339_v2  ;;  %v1017_v4 = vpop.permute.xlu0 %1016  ;;  %v1022_v28 = vpop.permute.xlu1 %1021 }
 0x25b   : > { %v1007_v29 = vpop.permute.xlu0 %1006  ;;  %v1012_v32 = vpop.permute.xlu1 %1011 }
 0x25e   : > { %956 = vmatmul.mubr.bf16.gmra.mxu1 %v2248_v52 }
 0x25f   : > { %1383 = vmatprep.mubr.bf16.mxu1 %v2339_v2 }
 0x316   : > { %v947_v0 = vpop.f32.mrf.mxu1 }
 0x317   : > { %v948_v39 = vadd.f32 %v947_v0, %v884_v40 }
 0x318   : > { %v949_v53 = vpop.f32.mrf.mxu1 }
 0x319   : > { %v950_v15 = vadd.f32 %v949_v53, %v884_v40 }
 0x31a   : > { %v951_v61 = vpop.f32.mrf.mxu1 }
 0x31b   : > { %v952_v16 = vadd.f32 %v951_v61, %v889_v57 }
 0x31c   : > { %v953_v54 = vpop.f32.mrf.mxu1 }
 0x31d   : > { %v954_v60 = vadd.f32 %v953_v54, %v889_v57  ;;  %v966_v12 = vpack.c.bf16 %v952_v16, %v948_v39 }
 0x31e   : > { %v957_v55 = vpop.f32.mrf.mxu1 }
 0x31f   : > { %v958_v14 = vadd.f32 %v957_v55, %v894_v37  ;;  %v967_v18 = vpack.c.bf16 %v954_v60, %v950_v15 }
 0x320   : > { %v959_v33 = vpop.f32.mrf.mxu1 }
 0x321   : > { %v960_v62 = vadd.f32 %v959_v33, %v894_v37 }
 0x322   : > { %v961_v56 = vpop.f32.mrf.mxu1 }
 0x323   : > { %v962_v58 = vadd.f32 %v961_v56, %v899_v36 }
 0x324   : > { %v963_v38 = vpop.f32.mrf.mxu1 }
 0x325   : > { %v964_v13 = vadd.f32 %v963_v38, %v899_v36  ;;  %v968_v17 = vpack.c.bf16 %v962_v58, %v958_v14 }
 0x327   : > { %v969_v11 = vpack.c.bf16 %v964_v13, %v960_v62 }
 0x329   : > { %1160 = vmatprep.subr.bf16.mxu0 %v969_v11 }
 0x32a   : > { %1161 = vmatpush1.bf16.msra.mxu0 %v968_v17 }
 0x32b   : > { %1162 = vmatprep.subr.bf16.mxu0 %v967_v18 }
 0x32e   : > { %1163 = vmatpush1.bf16.msra.mxu0 %v966_v12 }
 0x331   : > { %2080 = vmatmul.mubr.msk.bf16.vlgmr.msra.gmra.mxu0 %vm687_vm1, %v2249_v9 }
 0x332   : > { %1190 = vmatprep.mubr.bf16.mxu0 %v2339_v2 }
 0x339   : > { %2081 = vmatmul.mubr.msk.bf16.gmra.mxu0 %vm687_vm1, %v2250_v19 }
 0x33a   : > { %1200 = vmatprep.mubr.bf16.mxu0 %v2339_v2 }
 0x341   : > { %2082 = vmatmul.mubr.msk.bf16.gmra.mxu0 %vm687_vm1, %v2251_v20 }
 0x342   : > { %1210 = vmatprep.mubr.bf16.mxu0 %v2339_v2 }
 0x349   : > { %2083 = vmatmul.mubr.msk.bf16.gmra.mxu0 %vm687_vm1, %v2252_v42 }
 0x34a   : > { %1220 = vmatprep.mubr.bf16.mxu0 %v2339_v2 }
 0x351   : > { %2084 = vmatmul.mubr.msk.bf16.gmra.mxu0 %vm687_vm1, %v2253_v10 }
 0x352   : > { %1230 = vmatprep.mubr.bf16.mxu0 %v2339_v2 }
 0x359   : > { %2085 = vmatmul.mubr.msk.bf16.gmra.mxu0 %vm687_vm1, %v2254_v7 }
 0x35a   : > { %1240 = vmatprep.mubr.bf16.mxu0 %v2339_v2 }
 0x361   : > { %2086 = vmatmul.mubr.msk.bf16.gmra.mxu0 %vm687_vm1, %v2255_v21 }
 0x362   : > { %1250 = vmatprep.mubr.bf16.mxu0 %v2339_v2 }
 0x369   : > { %2087 = vmatmul.mubr.msk.bf16.gmra.mxu0 %vm687_vm1, %v2256_v22 }
 0x36a   : > { %1821 = vmatprep.mubr.bf16.mxu0 %v2339_v2 }
 0x3f1   : > { %v1182_v63 = vpop.f32.mrf.mxu0 }
 0x3f2   : > { %v1183_v31 = vadd.f32 %v1182_v63, %v1007_v29 }
 0x3f3   : > { %v1184_v30 = vpop.f32.mrf.mxu0 }
 0x3f4   : > { %v1185_v1 = vadd.f32 %v1184_v30, %v1007_v29  ;;  %v1261_v47 = vmax.f32 %v1183_v31, 0.0 }
 0x3f5   : > { %v1186_v46 = vpop.f32.mrf.mxu0 }
 0x3f6   : > { %v1187_v34 = vadd.f32 %v1186_v46, %v1012_v32  ;;  %v1262_v49 = vmax.f32 %v1185_v1, 0.0 }
 0x3f7   : > { %v1188_v35 = vpop.f32.mrf.mxu0 }
 0x3f8   : > { %v1263_v45 = vmax.f32 %v1187_v34, 0.0  ;;  %v1189_v59 = vadd.f32 %v1188_v35, %v1012_v32 }
 0x3f9   : > { %v1192_v48 = vpop.f32.mrf.mxu0 }
 0x3fa   : > { %v2884_v50 = vpack.c.bf16 %v1263_v45, %v1261_v47  ;;  %v1264_v51 = vmax.f32 %v1189_v59, 0.0  ;;  %v1193_v53 = vadd.f32 %v1192_v48, %v1017_v4 }
 0x3fb   : > { %v1194_v52 = vpop.f32.mrf.mxu0 }
 0x3fc   : > { %v2886_v0 = vpack.c.bf16 %v1264_v51, %v1262_v49  ;;  %v1195_v54 = vadd.f32 %v1194_v52, %v1017_v4  ;;  %v1265_v37 = vmax.f32 %v1193_v53, 0.0 }
 0x3fd   : > { %v1196_v61 = vpop.f32.mrf.mxu0 }
 0x3fe   : > { %v1197_v36 = vadd.f32 %v1196_v61, %v1022_v28  ;;  %v1266_v58 = vmax.f32 %v1195_v54, 0.0 }
 0x3ff   : > { %v1198_v55 = vpop.f32.mrf.mxu0 }
 0x400   : > { %v1267_v33 = vmax.f32 %v1197_v36, 0.0  ;;  %v1199_v56 = vadd.f32 %v1198_v55, %v1022_v28 }
 0x401   : > { %v2888_v57 = vpop.f32.mrf.mxu0 }
 0x402   : > { %v2890_v38 = vpack.c.bf16 %v1267_v33, %v1265_v37  ;;  %v1268_v60 = vmax.f32 %v1199_v56, 0.0 }
 0x403   : > { %v2892_v62 = vpop.f32.mrf.mxu0 }
 0x404   : > { %v2894_v13 = vpack.c.bf16 %v1268_v60, %v1266_v58 }
 0x405   : > { %v2896_v40 = vpop.f32.mrf.mxu0 }
 0x407   : > { %v2898_v14 = vpop.f32.mrf.mxu0 }
 0x409   : > { %v2900_v15 = vpop.f32.mrf.mxu0 }
 0x40b   : > { %v1214_v11 = vpop.f32.mrf.mxu0 }
 0x40d   : > { %v1216_v16 = vpop.f32.mrf.mxu0 }
 0x40f   : > { %v1218_v17 = vpop.f32.mrf.mxu0 }
 0x411   : > { %v1222_v18 = vpop.f32.mrf.mxu0 }
 0x413   : > { %v1224_v39 = vpop.f32.mrf.mxu0 }
 0x415   : > { %v1226_v12 = vpop.f32.mrf.mxu0 }
 0x417   : > { %v1228_v9 = vpop.f32.mrf.mxu0 }
 0x419   : > { %v1232_v19 = vpop.f32.mrf.mxu0 }
 0x41a   : > { %v1233_v56 = vadd.f32 %v1232_v19, %v2868_v6 }
 0x41b   : > { %v1234_v20 = vpop.f32.mrf.mxu0 }
 0x41c   : > { %v1235_v61 = vadd.f32 %v1234_v20, %v2868_v6  ;;  %v1227_v20 = vadd.f32 %v1226_v12, %v2874_v3  ;;  %v1215_v6 = vadd.f32 %v1214_v11, %v2876_v25 }
 0x41d   : > { %v1236_v42 = vpop.f32.mrf.mxu0 }
 0x41e   : > { %v1237_v36 = vadd.f32 %v1236_v42, %v2870_v23  ;;  %v1282_v60 = vmax.f32 %v1235_v61, 0.0  ;;  %v1274_v11 = vmax.f32 %v1215_v6, 0.0 }
 0x41f   : > { %v1238_v10 = vpop.f32.mrf.mxu0 }
 0x420   : > { %v1239_v59 = vadd.f32 %v1238_v10, %v2870_v23  ;;  %v1283_v10 = vmax.f32 %v1237_v36, 0.0  ;;  %v1219_v23 = vadd.f32 %v1218_v17, %v2878_v26  ;;  %v1213_v17 = vadd.f32 %v2900_v15, %v2876_v25 }
 0x421   : > { %v1242_v7 = vpop.f32.mrf.mxu0 }
 0x422   : > { %v1243_v52 = vadd.f32 %v1242_v7, %v2864_v8  ;;  %v1276_v12 = vmax.f32 %v1219_v23, 0.0  ;;  %v2266_v23 = vld [vmem:[%s3101_s3 + $0xb8] sm:$0xff]  }
 0x423   : > { %v1244_v21 = vpop.f32.mrf.mxu0 }
 0x424   : > { %v1245_v34 = vadd.f32 %v1244_v21, %v2864_v8  ;;  %v1285_v58 = vmax.f32 %v1243_v52, 0.0  ;;  %v1225_v8 = vadd.f32 %v1224_v39, %v2872_v24  ;;  %v1217_v39 = vadd.f32 %v1216_v16, %v2878_v26 }
 0x425   : > { %v1246_v22 = vpop.f32.mrf.mxu0  ;;  %v1207_v26 = vadd.f32 %v2896_v40, %v2882_v43  ;;  %v1337_v40 = vpop.permute.xlu1 %1336 }
 0x426   : > { %v1247_v47 = vadd.f32 %v1246_v22, %v2866_v44  ;;  %v1286_v54 = vmax.f32 %v1245_v34, 0.0  ;;  %v1281_v22 = vmax.f32 %v1233_v56, 0.0  ;;  %v1278_v19 = vmax.f32 %v1225_v8, 0.0  ;;  %v2259_v56 = vld [vmem:[%s3101_s3 + $0x80] sm:$0xff]   ;;  %v2261_v8 = vld [vmem:[%s3101_s3 + $0x90] sm:$0xff]  }
 0x427   : > { %v1248_v4 = vpop.f32.mrf.mxu0  ;;  %v1275_v16 = vmax.f32 %v1217_v39, 0.0  ;;  %v1271_v15 = vmax.f32 %v1207_v26, 0.0 }
 0x428   : > { %v1249_v30 = vadd.f32 %v1248_v4, %v2866_v44  ;;  %v1287_v55 = vmax.f32 %v1247_v47, 0.0  ;;  %v1284_v44 = vmax.f32 %v1239_v59, 0.0  ;;  %v1279_v4 = vmax.f32 %v1227_v20, 0.0  ;;  %v1332_v47 = vpop.permute.xlu0 %1331  ;;  %v2263_v20 = vld [vmem:[%s3101_s3 + $0xa0] sm:$0xff]  }
 0x429   : > { %v1252_v28 = vpop.f32.mrf.mxu0 }
 0x42a   : > { %v1253_v46 = vadd.f32 %v1252_v28, %v2860_v41  ;;  %v1288_v48 = vmax.f32 %v1249_v30, 0.0  ;;  %v1310_v7 = vpack.c.bf16 %v1287_v55, %v1285_v58  ;;  %v1309_v21 = vpack.c.bf16 %v1284_v44, %v1282_v60  ;;  %v2260_v58 = vld [vmem:[%s3101_s3 + $0x88] sm:$0xff]   ;;  %v2262_v60 = vld [vmem:[%s3101_s3 + $0x98] sm:$0xff]  }
 0x42b   : > { %v1254_v63 = vpop.f32.mrf.mxu0  ;;  %v1308_v28 = vpack.c.bf16 %v1283_v10, %v1281_v22  ;;  %v2264_v10 = vld [vmem:[%s3101_s3 + $0xa8] sm:$0xff]  }
 0x42c   : > { %v1255_v31 = vadd.f32 %v1254_v63, %v2860_v41  ;;  %v1289_v53 = vmax.f32 %v1253_v46, 0.0  ;;  %v1311_v33 = vpack.c.bf16 %v1288_v48, %v1286_v54  ;;  %v1322_v61 = vpop.permute.xlu0 %1321 }
 0x42d   : > { %v1256_v29 = vpop.f32.mrf.mxu0 }
 0x42e   : > { %v1257_v32 = vadd.f32 %v1256_v29, %v2862_v5  ;;  %v1290_v49 = vmax.f32 %v1255_v31, 0.0  ;;  %v1305_v31 = vpack.c.bf16 %v1276_v12, %v1274_v11 }
 0x42f   : > { %v1258_v1 = vpop.f32.mrf.mxu0 }
 0x430   : > { %v1259_v35 = vadd.f32 %v1258_v1, %v2862_v5  ;;  %v1291_v45 = vmax.f32 %v1257_v32, 0.0  ;;  %v1229_v5 = vadd.f32 %v1228_v9, %v2874_v3  ;;  %v1223_v9 = vadd.f32 %v1222_v18, %v2872_v24 }
 0x431   : > { %v1209_v3 = vadd.f32 %v2898_v14, %v2882_v43  ;;  %v1205_v24 = vadd.f32 %v2892_v62, %v2880_v27  ;;  %v1203_v14 = vadd.f32 %v2888_v57, %v2880_v27  ;;  %v1273_v32 = vmax.f32 %v1213_v17, 0.0  ;;  %v2257_v27 = vld [vmem:[%s3103_s5 + $0x10] sm:$0xff]   ;;  %v2258_v43 = vld [vmem:[%s3103_s5 + $0x18] sm:$0xff]  }
 0x432   : > { %v1292_v51 = vmax.f32 %v1259_v35, 0.0  ;;  %v1312_v37 = vpack.c.bf16 %v1291_v45, %v1289_v53  ;;  %v1280_v42 = vmax.f32 %v1229_v5, 0.0  ;;  %v1277_v29 = vmax.f32 %v1223_v9, 0.0 }
 0x433   : > { %v1272_v30 = vmax.f32 %v1209_v3, 0.0  ;;  %v1270_v25 = vmax.f32 %v1205_v24, 0.0  ;;  %v1304_v46 = vpack.c.bf16 %v1275_v16, %v1273_v32  ;;  %v1269_v62 = vmax.f32 %v1203_v14, 0.0 }
 0x434   : > { %v1313_v41 = vpack.c.bf16 %v1292_v51, %v1290_v49  ;;  %v1307_v63 = vpack.c.bf16 %v1280_v42, %v1278_v19  ;;  %v1306_v18 = vpack.c.bf16 %v1279_v4, %v1277_v29  ;;  %v2982_v42 = vpop.permute.xlu0 %1514 }
 0x435   : > { %v1303_v1 = vpack.c.bf16 %v1272_v30, %v1270_v25  ;;  %v1302_v34 = vpack.c.bf16 %v1271_v15, %v1269_v62 }
 0x436   : > { %1351 = vmatprep.subr.bf16.mxu1 %v1313_v41 }
 0x437   : > { %1352 = vmatpush1.bf16.msra.mxu1 %v1312_v37 }
 0x438   : > { %1353 = vmatprep.subr.bf16.mxu1 %v1311_v33  ;;  %v2986_v9 = vpop.permute.xlu0 %1504 }
 0x43b   : > { %1354 = vmatpush1.bf16.msra.mxu1 %v1310_v7  ;;  %v2265_v7 = vld [vmem:[%s3101_s3 + $0xb0] sm:$0xff]  }
 0x43c   : > { %1355 = vmatprep.subr.bf16.mxu1 %v1309_v21  ;;  %v2990_v6 = vpop.permute.xlu0 %1494 }
 0x43f   : > { %1356 = vmatpush1.bf16.msra.mxu1 %v1308_v28 }
 0x440   : > { %1357 = vmatprep.subr.bf16.mxu1 %v1307_v63  ;;  %v2994_v39 = vpop.permute.xlu0 %1484 }
 0x443   : > { %1358 = vmatpush1.bf16.msra.mxu1 %v1306_v18 }
 0x444   : > { %1359 = vmatprep.subr.bf16.mxu1 %v1305_v31  ;;  %v2998_v28 = vpop.permute.xlu0 %1474 }
 0x447   : > { %1360 = vmatpush1.bf16.msra.mxu1 %v1304_v46 }
 0x448   : > { %1361 = vmatprep.subr.bf16.mxu1 %v1303_v1  ;;  %v3002_v12 = vpop.permute.xlu0 %1464 }
 0x44b   : > { %1362 = vmatpush1.bf16.msra.mxu1 %v1302_v34 }
 0x44c   : > { %1363 = vmatprep.subr.bf16.mxu1 %v2894_v13  ;;  %v1455_v17 = vpop.permute.xlu0 %1454 }
 0x44f   : > { %1364 = vmatpush1.bf16.msra.mxu1 %v2890_v38 }
 0x450   : > { %1365 = vmatprep.subr.bf16.mxu1 %v2886_v0  ;;  %v1445_v11 = vpop.permute.xlu0 %1444 }
 0x453   : > { %1366 = vmatpush1.bf16.msra.mxu1 %v2884_v50  ;;  %v1327_v50 = vpop.permute.xlu1 %1326 }
 0x456   : > { %1384 = vmatmul.mubr.bf16.vlgmr.msra.gmra.mxu1 %v2257_v27 }
 0x457   : > { %1393 = vmatprep.mubr.bf16.mxu1 %v2339_v2  ;;  %v2984_v21 = vpop.permute.xlu1 %1519 }
 0x45b   : > { %v2988_v22 = vpop.permute.xlu1 %1509 }
 0x45e   : > { %1394 = vmatmul.mubr.bf16.gmra.mxu1 %v2258_v43 }
 0x45f   : > { %1618 = vmatprep.mubr.bf16.mxu1 %v2339_v2  ;;  %v2992_v19 = vpop.permute.xlu1 %1499 }
 0x463   : > { %v2996_v4 = vpop.permute.xlu1 %1489 }
 0x467   : > { %v3000_v3 = vpop.permute.xlu1 %1479 }
 0x46b   : > { %v3004_v63 = vpop.permute.xlu1 %1469 }
 0x46f   : > { %v1460_v29 = vpop.permute.xlu1 %1459 }
 0x473   : > { %v1450_v18 = vpop.permute.xlu1 %1449 }
 0x516   : > { %v1385_v57 = vpop.f32.mrf.mxu1 }
 0x517   : > { %v1386_v44 = vadd.f32 %v1385_v57, %v1322_v61 }
 0x518   : > { %v1387_v38 = vpop.f32.mrf.mxu1 }
 0x519   : > { %v1388_v41 = vadd.f32 %v1387_v38, %v1322_v61 }
 0x51a   : > { %v1389_v13 = vpop.f32.mrf.mxu1 }
 0x51b   : > { %v1390_v55 = vadd.f32 %v1389_v13, %v1327_v50 }
 0x51c   : > { %v1391_v0 = vpop.f32.mrf.mxu1 }
 0x51d   : > { %v1392_v51 = vadd.f32 %v1391_v0, %v1327_v50  ;;  %v1404_v33 = vpack.c.bf16 %v1390_v55, %v1386_v44 }
 0x51e   : > { %v1395_v35 = vpop.f32.mrf.mxu1 }
 0x51f   : > { %v1396_v54 = vadd.f32 %v1395_v35, %v1332_v47  ;;  %v1405_v5 = vpack.c.bf16 %v1392_v51, %v1388_v41 }
 0x520   : > { %v1397_v45 = vpop.f32.mrf.mxu1 }
 0x521   : > { %v1398_v52 = vadd.f32 %v1397_v45, %v1332_v47 }
 0x522   : > { %v1399_v59 = vpop.f32.mrf.mxu1 }
 0x523   : > { %v1400_v48 = vadd.f32 %v1399_v59, %v1337_v40 }
 0x524   : > { %v1401_v49 = vpop.f32.mrf.mxu1 }
 0x525   : > { %v1402_v53 = vadd.f32 %v1401_v49, %v1337_v40  ;;  %v1406_v37 = vpack.c.bf16 %v1400_v48, %v1396_v54 }
 0x527   : > { %v1407_v36 = vpack.c.bf16 %v1402_v53, %v1398_v52 }
 0x529   : > { %1598 = vmatprep.subr.bf16.mxu1 %v1407_v36 }
 0x52a   : > { %1599 = vmatpush1.bf16.msra.mxu1 %v1406_v37 }
 0x52b   : > { %1600 = vmatprep.subr.bf16.mxu1 %v1405_v5 }
 0x52e   : > { %1601 = vmatpush1.bf16.msra.mxu1 %v1404_v33 }
 0x531   : > { %2138 = vmatmul.mubr.msk.bf16.vlgmr.msra.gmra.mxu1 %vm687_vm1, %v2259_v56 }
 0x532   : > { %1628 = vmatprep.mubr.bf16.mxu1 %v2339_v2 }
 0x539   : > { %2139 = vmatmul.mubr.msk.bf16.gmra.mxu1 %vm687_vm1, %v2260_v58 }
 0x53a   : > { %1638 = vmatprep.mubr.bf16.mxu1 %v2339_v2 }
 0x541   : > { %2140 = vmatmul.mubr.msk.bf16.gmra.mxu1 %vm687_vm1, %v2261_v8 }
 0x542   : > { %1648 = vmatprep.mubr.bf16.mxu1 %v2339_v2 }
 0x549   : > { %2141 = vmatmul.mubr.msk.bf16.gmra.mxu1 %vm687_vm1, %v2262_v60 }
 0x54a   : > { %1658 = vmatprep.mubr.bf16.mxu1 %v2339_v2 }
 0x551   : > { %2142 = vmatmul.mubr.msk.bf16.gmra.mxu1 %vm687_vm1, %v2263_v20 }
 0x552   : > { %1668 = vmatprep.mubr.bf16.mxu1 %v2339_v2 }
 0x559   : > { %2143 = vmatmul.mubr.msk.bf16.gmra.mxu1 %vm687_vm1, %v2264_v10 }
 0x55a   : > { %1678 = vmatprep.mubr.bf16.mxu1 %v2339_v2 }
 0x561   : > { %2144 = vmatmul.mubr.msk.bf16.gmra.mxu1 %vm687_vm1, %v2265_v7 }
 0x562   : > { %1688 = vmatprep.mubr.bf16.mxu1 %v2339_v2 }
 0x569   : > { %2145 = vmatmul.mubr.msk.bf16.gmra.mxu1 %vm687_vm1, %v2266_v23 }
 0x5f1   : > { %v1620_v24 = vpop.f32.mrf.mxu1 }
 0x5f2   : > { %v1621_v16 = vadd.f32 %v1620_v24, %v1445_v11 }
 0x5f3   : > { %v1622_v26 = vpop.f32.mrf.mxu1 }
 0x5f4   : > { %v1623_v31 = vadd.f32 %v1622_v26, %v1445_v11  ;;  %v1699_v25 = vmax.f32 %v1621_v16, 0.0 }
 0x5f5   : > { %v1624_v30 = vpop.f32.mrf.mxu1 }
 0x5f6   : > { %v1625_v14 = vadd.f32 %v1624_v30, %v1450_v18  ;;  %v1700_v62 = vmax.f32 %v1623_v31, 0.0 }
 0x5f7   : > { %v1626_v32 = vpop.f32.mrf.mxu1 }
 0x5f8   : > { %v1701_v15 = vmax.f32 %v1625_v14, 0.0  ;;  %v1627_v46 = vadd.f32 %v1626_v32, %v1450_v18 }
 0x5f9   : > { %v1630_v1 = vpop.f32.mrf.mxu1 }
 0x5fa   : > { %v3006_v34 = vpack.c.bf16 %v1701_v15, %v1699_v25  ;;  %v1702_v27 = vmax.f32 %v1627_v46, 0.0  ;;  %v1631_v38 = vadd.f32 %v1630_v1, %v1455_v17 }
 0x5fb   : > { %v1632_v43 = vpop.f32.mrf.mxu1 }
 0x5fc   : > { %v3008_v57 = vpack.c.bf16 %v1702_v27, %v1700_v62  ;;  %v1633_v0 = vadd.f32 %v1632_v43, %v1455_v17  ;;  %v1703_v47 = vmax.f32 %v1631_v38, 0.0 }
 0x5fd   : > { %v1634_v13 = vpop.f32.mrf.mxu1 }
 0x5fe   : > { %v1635_v40 = vadd.f32 %v1634_v13, %v1460_v29  ;;  %v1704_v48 = vmax.f32 %v1633_v0, 0.0 }
 0x5ff   : > { %v1636_v35 = vpop.f32.mrf.mxu1 }
 0x600   : > { %v1705_v45 = vmax.f32 %v1635_v40, 0.0  ;;  %v1637_v59 = vadd.f32 %v1636_v35, %v1460_v29 }
 0x601   : > { %v3010_v50 = vpop.f32.mrf.mxu1 }
 0x602   : > { %v3012_v49 = vpack.c.bf16 %v1705_v45, %v1703_v47  ;;  %v1706_v51 = vmax.f32 %v1637_v59, 0.0 }
 0x603   : > { %v3014_v52 = vpop.f32.mrf.mxu1 }
 0x604   : > { %v3016_v53 = vpack.c.bf16 %v1706_v51, %v1704_v48 }
 0x605   : > { %v3018_v61 = vpop.f32.mrf.mxu1 }
 0x607   : > { %v3020_v54 = vpop.f32.mrf.mxu1 }
 0x609   : > { %v3022_v41 = vpop.f32.mrf.mxu1 }
 0x60b   : > { %v1652_v36 = vpop.f32.mrf.mxu1 }
 0x60d   : > { %v1654_v55 = vpop.f32.mrf.mxu1 }
 0x60f   : > { %v1656_v37 = vpop.f32.mrf.mxu1 }
 0x611   : > { %v1660_v5 = vpop.f32.mrf.mxu1 }
 0x613   : > { %v1662_v44 = vpop.f32.mrf.mxu1 }
 0x615   : > { %v1664_v33 = vpop.f32.mrf.mxu1 }
 0x617   : > { %v1666_v56 = vpop.f32.mrf.mxu1 }
 0x619   : > { %v1670_v58 = vpop.f32.mrf.mxu1 }
 0x61a   : > { %v1671_v59 = vadd.f32 %v1670_v58, %v2990_v6 }
 0x61b   : > { %v1672_v8 = vpop.f32.mrf.mxu1 }
 0x61c   : > { %v1673_v13 = vadd.f32 %v1672_v8, %v2990_v6  ;;  %v1665_v8 = vadd.f32 %v1664_v33, %v2996_v4  ;;  %v1653_v6 = vadd.f32 %v1652_v36, %v2998_v28 }
 0x61d   : > { %v1674_v60 = vpop.f32.mrf.mxu1 }
 0x61e   : > { %v1675_v40 = vadd.f32 %v1674_v60, %v2992_v19  ;;  %v1720_v51 = vmax.f32 %v1673_v13, 0.0  ;;  %v1712_v36 = vmax.f32 %v1653_v6, 0.0 }
 0x61f   : > { %v1676_v20 = vpop.f32.mrf.mxu1 }
 0x620   : > { %v1677_v46 = vadd.f32 %v1676_v20, %v2992_v19  ;;  %v1721_v20 = vmax.f32 %v1675_v40, 0.0  ;;  %v1657_v19 = vadd.f32 %v1656_v37, %v3000_v3  ;;  %v1651_v37 = vadd.f32 %v3022_v41, %v2998_v28 }
 0x621   : > { %v1680_v10 = vpop.f32.mrf.mxu1 }
 0x622   : > { %v1681_v43 = vadd.f32 %v1680_v10, %v2986_v9  ;;  %v1714_v33 = vmax.f32 %v1657_v19, 0.0 }
 0x623   : > { %v1682_v7 = vpop.f32.mrf.mxu1 }
 0x624   : > { %v1683_v14 = vadd.f32 %v1682_v7, %v2986_v9  ;;  %v1723_v48 = vmax.f32 %v1681_v43, 0.0  ;;  %v1663_v9 = vadd.f32 %v1662_v44, %v2994_v39  ;;  %v1655_v44 = vadd.f32 %v1654_v55, %v3000_v3 }
 0x625   : > { %v1684_v23 = vpop.f32.mrf.mxu1  ;;  %v1645_v3 = vadd.f32 %v3018_v61, %v3004_v63 }
 0x626   : > { %v1685_v25 = vadd.f32 %v1684_v23, %v2988_v22  ;;  %v1724_v0 = vmax.f32 %v1683_v14, 0.0  ;;  %v1719_v23 = vmax.f32 %v1671_v59, 0.0  ;;  %v1716_v58 = vmax.f32 %v1663_v9, 0.0 }
 0x627   : > { %v1686_v17 = vpop.f32.mrf.mxu1  ;;  %v1713_v55 = vmax.f32 %v1655_v44, 0.0  ;;  %v1709_v41 = vmax.f32 %v1645_v3, 0.0 }
 0x628   : > { %v1687_v26 = vadd.f32 %v1686_v17, %v2988_v22  ;;  %v1725_v35 = vmax.f32 %v1685_v25, 0.0  ;;  %v1722_v22 = vmax.f32 %v1677_v46, 0.0  ;;  %v1717_v17 = vmax.f32 %v1665_v8, 0.0 }
 0x629   : > { %v1690_v29 = vpop.f32.mrf.mxu1 }
 0x62a   : > { %v1691_v30 = vadd.f32 %v1690_v29, %v2982_v42  ;;  %v1726_v1 = vmax.f32 %v1687_v26, 0.0  ;;  %v1748_v10 = vpack.c.bf16 %v1725_v35, %v1723_v48  ;;  %v1747_v7 = vpack.c.bf16 %v1722_v22, %v1720_v51 }
 0x62b   : > { %v1692_v24 = vpop.f32.mrf.mxu1  ;;  %v1746_v29 = vpack.c.bf16 %v1721_v20, %v1719_v23 }
 0x62c   : > { %v1693_v16 = vadd.f32 %v1692_v24, %v2982_v42  ;;  %v1727_v38 = vmax.f32 %v1691_v30, 0.0  ;;  %v1749_v45 = vpack.c.bf16 %v1726_v1, %v1724_v0 }
 0x62d   : > { %v1694_v11 = vpop.f32.mrf.mxu1 }
 0x62e   : > { %v1695_v18 = vadd.f32 %v1694_v11, %v2984_v21  ;;  %v1728_v62 = vmax.f32 %v1693_v16, 0.0  ;;  %v1743_v16 = vpack.c.bf16 %v1714_v33, %v1712_v36 }
 0x62f   : > { %v1696_v31 = vpop.f32.mrf.mxu1 }
 0x630   : > { %v1697_v32 = vadd.f32 %v1696_v31, %v2984_v21  ;;  %v1729_v15 = vmax.f32 %v1695_v18, 0.0  ;;  %v1667_v21 = vadd.f32 %v1666_v56, %v2996_v4  ;;  %v1661_v56 = vadd.f32 %v1660_v5, %v2994_v39 }
 0x631   : > { %v1647_v4 = vadd.f32 %v3020_v54, %v3004_v63  ;;  %v1643_v39 = vadd.f32 %v3014_v52, %v3002_v12  ;;  %v1641_v54 = vadd.f32 %v3010_v50, %v3002_v12  ;;  %v1711_v18 = vmax.f32 %v1651_v37, 0.0  ;;  %v2267_v12 = vld [vmem:[%s3103_s5 + $0x20] sm:$0xff]   ;;  %v2268_v63 = vld [vmem:[%s3103_s5 + $0x28] sm:$0xff]   ;;  %v1760_v50 = vpop.permute.xlu0 %1759 }
 0x632   : > { %v1730_v27 = vmax.f32 %v1697_v32, 0.0  ;;  %v1750_v47 = vpack.c.bf16 %v1729_v15, %v1727_v38  ;;  %v1718_v60 = vmax.f32 %v1667_v21, 0.0  ;;  %v1715_v11 = vmax.f32 %v1661_v56, 0.0 }
 0x633   : > { %v1710_v26 = vmax.f32 %v1647_v4, 0.0  ;;  %v1708_v28 = vmax.f32 %v1643_v39, 0.0  ;;  %v1742_v30 = vpack.c.bf16 %v1713_v55, %v1711_v18  ;;  %v1707_v52 = vmax.f32 %v1641_v54, 0.0 }
 0x634   : > { %v1751_v42 = vpack.c.bf16 %v1730_v27, %v1728_v62  ;;  %v1745_v24 = vpack.c.bf16 %v1718_v60, %v1716_v58  ;;  %v1744_v5 = vpack.c.bf16 %v1717_v17, %v1715_v11 }
 0x635   : > { %v1741_v31 = vpack.c.bf16 %v1710_v26, %v1708_v28  ;;  %v1740_v14 = vpack.c.bf16 %v1709_v41, %v1707_v52  ;;  %v1770_v61 = vpop.permute.xlu0 %1769 }
 0x636   : > { %1789 = vmatprep.subr.bf16.mxu0 %v1751_v42 }
 0x637   : > { %1790 = vmatpush1.bf16.msra.mxu0 %v1750_v47 }
 0x638   : > { %1791 = vmatprep.subr.bf16.mxu0 %v1749_v45 }
 0x639   : > { %v1854_v25 = vpop.permute.xlu0 %1853 }
 0x63b   : > { %1792 = vmatpush1.bf16.msra.mxu0 %v1748_v10 }
 0x63c   : > { %1793 = vmatprep.subr.bf16.mxu0 %v1747_v7  ;;  %v1898_v7 = vlaneseq }
 0x63d   : > { %v1859_v0 = vpop.permute.xlu0 %1858 }
 0x63e   : > { %v1899_v17 = vshrl.u32 %v1898_v7, 7  ;;  %vm1934_vm2 = vcmp.lt.s32.totalorder %v1898_v7, 256 }
 0x63f   : > { %1794 = vmatpush1.bf16.msra.mxu0 %v1746_v29 }
 0x640   : > { %1795 = vmatprep.subr.bf16.mxu0 %v1745_v24  ;;  %v1900_v37 = vsub.s32 0, %v1899_v17 }
 0x641   : > { %v1896_v36 = vpop.permute.xlu0 %1895 }
 0x643   : > { %1796 = vmatpush1.bf16.msra.mxu0 %v1744_v5  ;;  %v1901_v5 = vrot.slane %v1896_v36, %v1900_v37 }
 0x644   : > { %1797 = vmatprep.subr.bf16.mxu0 %v1743_v16 }
 0x647   : > { %1798 = vmatpush1.bf16.msra.mxu0 %v1742_v30 }
 0x648   : > { %1799 = vmatprep.subr.bf16.mxu0 %v1741_v31 }
 0x64b   : > { %1800 = vmatpush1.bf16.msra.mxu0 %v1740_v14 }
 0x64c   : > { %1801 = vmatprep.subr.bf16.mxu0 %v3016_v53  ;;  %v1765_v53 = vpop.permute.xlu1 %1764 }
 0x64f   : > { %1802 = vmatpush1.bf16.msra.mxu0 %v3012_v49 }
 0x650   : > { %1803 = vmatprep.subr.bf16.mxu0 %v3008_v57  ;;  %v1849_v32 = vpop.permute.xlu1 %1848 }
 0x653   : > { %1804 = vmatpush1.bf16.msra.mxu0 %v3006_v34 }
 0x654   : > { %v1775_v27 = vpop.permute.xlu1 %1774 }
 0x656   : > { %1822 = vmatmul.mubr.bf16.vlgmr.msra.gmra.mxu0 %v2267_v12 }
 0x657   : > { %1831 = vmatprep.mubr.bf16.mxu0 %v2339_v2 }
 0x658   : > { %v1864_v51 = vpop.permute.xlu1 %1863 }
 0x65e   : > { %1832 = vmatmul.mubr.bf16.gmra.mxu0 %v2268_v63 }
 0x716   : > { %v1823_v49 = vpop.f32.mrf.mxu0 }
 0x717   : > { %v1824_v62 = vadd.f32 %v1823_v49, %v1760_v50 }
 0x718   : > { %v1825_v57 = vpop.f32.mrf.mxu0 }
 0x719   : > { %v1826_v2 = vadd.f32 %v1825_v57, %v1760_v50  ;;  %v1866_v40 = vmul.f32 %v1849_v32, %v1824_v62 }
 0x71a   : > { %v1827_v15 = vpop.f32.mrf.mxu0 }
 0x71b   : > { %v1828_v46 = vadd.f32 %v1827_v15, %v1765_v53  ;;  %v1867_v45 = vmul.f32 %v1849_v32, %v1826_v2 }
 0x71c   : > { %v1829_v1 = vpop.f32.mrf.mxu0 }
 0x71d   : > { %v1830_v34 = vadd.f32 %v1829_v1, %v1765_v53  ;;  %v1868_v38 = vmul.f32 %v1854_v25, %v1828_v46  ;;  %v2340_v53 = vmov 1966171168  }
 0x71e   : > { %v1833_v43 = vpop.f32.mrf.mxu0 }
 0x71f   : > { %v1834_v13 = vadd.f32 %v1833_v43, %v1770_v61  ;;  %v1869_v35 = vmul.f32 %v1854_v25, %v1830_v34  ;;  %v1874_v59 = vadd.f32 %v1868_v38, %v1866_v40 }
 0x720   : > { %v1835_v42 = vpop.f32.mrf.mxu0 }
 0x721   : > { %v1870_v47 = vmul.f32 %v1859_v0, %v1834_v13  ;;  %v1836_v21 = vadd.f32 %v1835_v42, %v1770_v61  ;;  %v1883_v20 = vadd.f32 %v1869_v35, %v1867_v45  ;;  %v1918_v61 = vunpack.c.l.s4 %v2340_v53 }
 0x722   : > { %v1837_v22 = vpop.f32.mrf.mxu0 }
 0x723   : > { %v1871_v48 = vmul.f32 %v1859_v0, %v1836_v21  ;;  %v1838_v9 = vadd.f32 %v1837_v22, %v1775_v27  ;;  %v1875_v10 = vadd.f32 %v1874_v59, %v1870_v47  ;;  %v1919_v49 = vunpack.c.0.s8 %v1918_v61 }
 0x724   : > { %v1839_v8 = vpop.f32.mrf.mxu0 }
 0x725   : > { %v1872_v19 = vmul.f32 %v1864_v51, %v1838_v9  ;;  %v1840_v60 = vadd.f32 %v1839_v8, %v1775_v27  ;;  %v1884_v56 = vadd.f32 %v1883_v20, %v1871_v48  ;;  %v1922_v57 = vsub.s32 %v1919_v49, %v1899_v17 }
 0x727   : > { %v1876_v23 = vadd.f32 %v1875_v10, %v1872_v19  ;;  %v1873_v6 = vmul.f32 %v1864_v51, %v1840_v60 }
 0x729   : > { %v1877_v58 = vrot.slane %v1876_v23, 4  ;;  %v1885_v44 = vadd.f32 %v1884_v56, %v1873_v6 }
 0x72b   : > { %v1878_v29 = vadd.f32 %v1877_v58, %v1876_v23  ;;  %v1886_v4 = vrot.slane %v1885_v44, 4 }
 0x72d   : > { %v1879_v33 = vrot.slane %v1878_v29, 2  ;;  %v1887_v24 = vadd.f32 %v1886_v4, %v1885_v44 }
 0x72f   : > { %v1880_v11 = vadd.f32 %v1879_v33, %v1878_v29  ;;  %v1888_v39 = vrot.slane %v1887_v24, 2 }
 0x731   : > { %v1881_v3 = vrot.slane %v1880_v11, 1  ;;  %v1889_v55 = vadd.f32 %v1888_v39, %v1887_v24 }
 0x733   : > { %v1882_v26 = vadd.f32 %v1881_v3, %v1880_v11  ;;  %v1890_v16 = vrot.slane %v1889_v55, 1 }
 0x735   : > { %v1902_v54 = vadd.f32 %v1901_v5, %v1882_v26  ;;  %v1891_v18 = vadd.f32 %v1890_v16, %v1889_v55 }
 0x737   : > { %v1904_v28 = vsub.f32 0.0, %v1902_v54  ;;  %v1903_v41 = vadd.f32 %v1901_v5, %v1891_v18 }
 0x739   : > { %v1906_v30 = vmul.f32 1.442695, %v1904_v28  ;;  %v1905_v31 = vsub.f32 0.0, %v1903_v41 }
 0x73b   : > { %2269 = vpow2.f32 %v1906_v30  ;;  %v1908_v52 = vmul.f32 1.442695, %v1905_v31 }
 0x73d   : > { %2271 = vpow2.f32 %v1908_v52 }
 0x748   : > { %v2270_v14 = vpop.eup %2269 }
 0x749   : > { %v1910_v12 = vadd.f32 1.0, %v2270_v14 }
 0x74a   : > { %v2272_v63 = vpop.eup %2271 }
 0x74b   : > { %v1911_v50 = vadd.f32 1.0, %v2272_v63  ;;  %2273 = vrcp.f32 %v1910_v12 }
 0x74d   : > { %2275 = vrcp.f32 %v1911_v50 }
 0x758   : > { %v2274_v32 = vpop.eup %2273 }
 0x75a   : > { %v2276_v25 = vpop.eup %2275 }
 0x75b   : > { %v1916_v15 = vcombine.low %v2274_v32, %v2276_v25 }
 0x75d   : > { %v1923_v46 = vrot.slane %v1916_v15, %v1922_v57 }
 0x75f   : > { %v1930_v1 = vrot.slane %v1923_v46, %v1922_v57 }
 0x761   : > { %1936 = vst.msk [vmem:[%s328_s26] sm:$0x3] %vm1934_vm2, %v1930_v1 }
 0x762   : > { %2290 = shalt.err (!%p2287_p3)
}
 0x763   : > { %s2291_s23 = scalar_lea.hbm %s1950_s30, 32  ;;  %s2295_s25 = scalar_lea.hbm %s3107_s9, 64 }
 0x764   : > { %p2292_p4 = scmp.ne.s32.totalorder %s1950_s30, %s2291_s23  ;;  %p2296_p9 = scmp.lt.s32.totalorder %s1950_s30, %s3107_s9 }
 0x765   : > { %p2297_p10 = scmp.lt.s32.totalorder %s2295_s25, %s2291_s23 }
 0x766   : > { %p2293_p7 = pnand %p2292_p4, %p2430_p5 }
 0x767   : > { %p2298_p11 = por %p2297_p10, %p2296_p9 }
 0x768   : > { %p2294_p8 = pneg %p2293_p7 }
 0x76a   : > { %p2299_p12 = pnand %p2298_p11, %p2294_p8 }
 0x76c   : > { %2302 = shalt.err (!%p2299_p12)
}
 0x76d   : > { %2194 = dma.vmem_to_hbm [thread:$0]  (%p2430_p5), %s1953_s27, 32, %s1950_s30, %s1938_s10  }
 0x76e PF: > { %p2200_p13 = scmp.ge.s32.totalorder %s2337_s14, 2  ;;  %s1964_s29 = sand.u32 1, %s2325_s11  }
 0x76f   : > { %s1965_s8 = scalar_lea.sflag [#allocation4], %s1964_s29 }
 0x770   : > { %p2197_p0 = pnand %p2200_p13, %p2434_p6 }
 0x772   : > { %p2198_p1 = pneg %p2197_p0 }
 0x774   : > { %2320 = dma.done.wait (%p2198_p1), %s1965_s8, 32  }
 0x775   : > { %2322 = vsyncadd (%p2198_p1), %s1965_s8, 4294967264  ;;  %p21_p2 = scmp.ge.s32.totalorder %s2418_s16, 4   ;;  %s3110_s11 = smov %s2329_s12 }
 0x776   : > { %s3111_s12 = smov %s2333_s13  ;;  %s3112_s13 = smov %s2428_s19 }
 0x777   : > { %s3113_s14 = smov %s2418_s16  ;;  %23 = sbr.rel (!%p21_p2) target bundleno = 6 (0x6), region = 99 }
 0x77c   :  { %1970 = vsyncpa [#allocation4], 1 }
 0x77d   :  { %1972 = vsyncpa [#allocation4 + $0x1], 1 }

</bundles_post_ra>
